<compile_context>
chip_gen: v6e
topology: v6e:2x2x1
jax: 0.10.0
libtpu: 0.0.40
codegen_flags: <defaults>
</compile_context>

<pallas_src>
import functools

import jax
import jax.numpy as jnp
import numpy as np
from jax.experimental import pallas as pl
from jax.experimental.pallas import tpu as pltpu


def lstm_kernel(x_ref, wih1_ref, whh1_ref, b1_ref, wih2_ref, whh2_ref, b2_ref,
                out_ref, *, T, Bp):
    """Single-invocation kernel: whole sequence in VMEM, recurrence unrolled.

    x_ref:   (T*Bp, D_in) time-major, batch padded to Bp (sublane-aligned)
    wih1:    (D_in, 4H)   whh1: (H, 4H)   b1: (1, 4H)
    wih2:    (H, 4H)      whh2: (H, 4H)   b2: (1, 4H)
    All weights/biases arrive with the i/f/o gate columns pre-scaled by 0.5
    (PyTorch gate order i,f,g,o) so sigmoid can be evaluated via one tanh.
    out_ref: (B, H)       top-layer hidden state at the last timestep.
    """
    B, H = out_ref.shape

    # Phase 0: non-recurrent layer-1 input projection for ALL timesteps at
    # once (+ layer-1 bias folded in exactly once).
    x_proj = (jnp.dot(x_ref[...], wih1_ref[...],
                      preferred_element_type=jnp.float32)
              + b1_ref[...])                                   # (T*Bp, 4H)

    whh1 = whh1_ref[...]                                       # (H, 4H)
    wih2 = wih2_ref[...]                                       # (H, 4H)
    whh2 = whh2_ref[...]                                       # (H, 4H)
    b2 = jnp.broadcast_to(b2_ref[...], (Bp, 4 * H))            # hoisted

    def gates_to_hc(gates, c_prev):
        # Single EUP pass over the whole gate block. Because the i/f/o
        # pre-activations were halved at init, sigmoid(raw) == 0.5*t + 0.5.
        t = jnp.tanh(gates)
        s = 0.5 * t + 0.5
        i = s[:, 0 * H:1 * H]
        f = s[:, 1 * H:2 * H]
        g = t[:, 2 * H:3 * H]
        o = s[:, 3 * H:4 * H]
        c_new = f * c_prev + i * g
        h_new = o * jnp.tanh(c_new)
        return h_new, c_new

    z = jnp.zeros((Bp, H), jnp.float32)
    h1, c1, h2, c2 = z, z, z, z

    # Fully-unrolled time loop (T static & small).
    for t in range(T):
        # Layer-2 recurrent partial product: depends only on h2(t-1), so it
        # sits off the h1 critical path (un-fused from the old concat matmul).
        g2_rec = jnp.dot(h2, whh2, preferred_element_type=jnp.float32)

        # Layer 1: sublane-aligned whole-vreg static slice (Bp == 8); only
        # the recurrent matmul stays on the serial path.
        g1 = x_proj[t * Bp:(t + 1) * Bp, :] + jnp.dot(
            h1, whh1, preferred_element_type=jnp.float32)
        h1, c1 = gates_to_hc(g1, c1)

        # TODO(synk): nn.LSTM applies dropout(0.1) between layers only in
        # training mode; eval-mode semantics (no dropout) implemented here.

        # Layer 2: input partial once h1(t) exists, then combine.
        g2 = jnp.dot(h1, wih2, preferred_element_type=jnp.float32) + g2_rec + b2
        h2, c2 = gates_to_hc(g2, c2)

    # Slice the real batch rows exactly once at the final store.
    out_ref[...] = h2[:B, :].astype(out_ref.dtype)


def prepare_params(params):
    """One-time host-side weight prep (call once, outside the serving loop):
    scale the i/f/o gate columns (PyTorch order i,f,g,o) of every weight and
    bias by 0.5 so the kernel evaluates sigmoid via a single tanh pass."""
    H = params["whh1"].shape[0]
    half = jnp.full((1, H), 0.5, jnp.float32)
    one = jnp.ones((1, H), jnp.float32)
    scale = jnp.concatenate([half, half, one, half], axis=1)   # (1, 4H)
    return {k: (params[k] * scale).astype(jnp.float32)
            for k in ("wih1", "whh1", "b1", "wih2", "whh2", "b2")}


def lstm_encoder(x, prep):
    """x: (B, T, D_in) batch_first, float32. `prep` = prepare_params(params).
    Returns (B, H) == h_t[:, -1, :]."""
    B, T, D_in = x.shape
    H = prep["whh1"].shape[0]
    Bp = ((B + 7) // 8) * 8            # sublane-aligned padded batch (>= 8)

    # Time-major, zero-pad batch to Bp, flatten so the layer-1 projection is
    # one batched matmul and per-step slices are whole-vreg aligned.
    x_tm = jnp.transpose(x, (1, 0, 2))                         # (T, B, D_in)
    x_pad = jnp.pad(x_tm, ((0, 0), (0, Bp - B), (0, 0)))       # (T, Bp, D_in)
    x_flat = x_pad.reshape(T * Bp, D_in)

    vmem = pl.BlockSpec(memory_space=pltpu.MemorySpace.VMEM)
    kernel = functools.partial(lstm_kernel, T=T, Bp=Bp)
    return pl.pallas_call(
        kernel,
        out_shape=jax.ShapeDtypeStruct((B, H), jnp.float32),
        in_specs=[vmem] * 7,
        out_specs=vmem,
    )(x_flat, prep["wih1"], prep["whh1"], prep["b1"],
      prep["wih2"], prep["whh2"], prep["b2"])


def init_params(key, input_dim=6, d_model=32):
    """PyTorch-style uniform(-1/sqrt(H), 1/sqrt(H)) init.
    Weights stored pre-transposed as (in_features, 4H); biases combined (b_ih+b_hh)."""
    H = d_model
    k = 1.0 / np.sqrt(H)
    keys = jax.random.split(key, 8)
    u = lambda kk, shp: jax.random.uniform(kk, shp, jnp.float32, -k, k)
    return {
        "wih1": u(keys[0], (input_dim, 4 * H)),
        "whh1": u(keys[1], (H, 4 * H)),
        "b1":   (u(keys[2], (1, 4 * H)) + u(keys[3], (1, 4 * H))),
        "wih2": u(keys[4], (H, 4 * H)),
        "whh2": u(keys[5], (H, 4 * H)),
        "b2":   (u(keys[6], (1, 4 * H)) + u(keys[7], (1, 4 * H))),
    }


def lstm_encoder_ref(x, params):
    """Pure-JAX reference (lax.scan) on the ORIGINAL (unscaled) params, with
    identical gate conventions to torch.nn.LSTM (eval mode)."""
    H = params["whh1"].shape[0]
    B = x.shape[0]

    def cell(x_in, h_prev, c_prev, wih, whh, b):
        gates = x_in @ wih + h_prev @ whh + b
        i = jax.nn.sigmoid(gates[:, 0 * H:1 * H])
        f = jax.nn.sigmoid(gates[:, 1 * H:2 * H])
        g = jnp.tanh(gates[:, 2 * H:3 * H])
        o = jax.nn.sigmoid(gates[:, 3 * H:4 * H])
        c_new = f * c_prev + i * g
        return o * jnp.tanh(c_new), c_new

    def step(carry, x_t):
        h1, c1, h2, c2 = carry
        h1, c1 = cell(x_t, h1, c1, params["wih1"], params["whh1"], params["b1"])
        h2, c2 = cell(h1, h2, c2, params["wih2"], params["whh2"], params["b2"])
        return (h1, c1, h2, c2), None

    z = jnp.zeros((B, H), jnp.float32)
    (h1, c1, h2, c2), _ = jax.lax.scan(step, (z, z, z, z),
                                       jnp.transpose(x, (1, 0, 2)))
    return h2


if __name__ == "__main__":
    B, T, D_in, H = 2, 8, 6, 32
    key = jax.random.PRNGKey(0)
    k_x, k_p = jax.random.split(key)

    x = jax.random.normal(k_x, (B, T, D_in), dtype=jnp.float32)
    params = init_params(k_p, input_dim=D_in, d_model=H)
    prep = prepare_params(params)          # one-time host-side weight prep

    out = lstm_encoder(x, prep)
    out = jax.block_until_ready(out)

    ref = jax.block_until_ready(lstm_encoder_ref(x, params))
    np.testing.assert_allclose(np.asarray(out), np.asarray(ref),
                               rtol=1e-4, atol=1e-4)
    assert out.shape == (B, H)
    print("KERNEL_OK")
</pallas_src>

<mosaic_0001>
module attributes {stable_mosaic.version = 11 : i64} {
  func.func @lstm_kernel(%arg0: memref<64x6xf32, #tpu.memory_space<vmem>>, %arg1: memref<6x128xf32, #tpu.memory_space<vmem>>, %arg2: memref<32x128xf32, #tpu.memory_space<vmem>>, %arg3: memref<1x128xf32, #tpu.memory_space<vmem>>, %arg4: memref<32x128xf32, #tpu.memory_space<vmem>>, %arg5: memref<32x128xf32, #tpu.memory_space<vmem>>, %arg6: memref<1x128xf32, #tpu.memory_space<vmem>>, %arg7: memref<2x32xf32, #tpu.memory_space<vmem>>) attributes {dimension_semantics = [], scalar_prefetch = 0 : i64, scratch_operands = 0 : i64, tpu.core_type = #tpu.core_type<tc>} {
    %c0 = arith.constant 0 : index
    %c0_0 = arith.constant 0 : index
    %0 = vector.load %arg0[%c0, %c0_0] : memref<64x6xf32, #tpu.memory_space<vmem>>, vector<64x6xf32>
    %c0_1 = arith.constant 0 : index
    %c0_2 = arith.constant 0 : index
    %1 = vector.load %arg1[%c0_1, %c0_2] : memref<6x128xf32, #tpu.memory_space<vmem>>, vector<6x128xf32>
    %cst = arith.constant dense<0.000000e+00> : vector<64x128xf32>
    %2 = tpu.matmul %0, %1, %cst {dimension_numbers = #tpu.dot_dimension_numbers<[1], [0], [0], [1], [0, 0, 1, 1], [], []>} : vector<64x6xf32>, vector<6x128xf32>, vector<64x128xf32> -> vector<64x128xf32>
    %c0_3 = arith.constant 0 : index
    %c0_4 = arith.constant 0 : index
    %3 = vector.load %arg3[%c0_3, %c0_4] : memref<1x128xf32, #tpu.memory_space<vmem>>, vector<1x128xf32>
    %4 = vector.broadcast %3 : vector<1x128xf32> to vector<64x128xf32>
    %5 = arith.addf %2, %4 : vector<64x128xf32>
    %c0_5 = arith.constant 0 : index
    %c0_6 = arith.constant 0 : index
    %6 = vector.load %arg2[%c0_5, %c0_6] : memref<32x128xf32, #tpu.memory_space<vmem>>, vector<32x128xf32>
    %c0_7 = arith.constant 0 : index
    %c0_8 = arith.constant 0 : index
    %7 = vector.load %arg4[%c0_7, %c0_8] : memref<32x128xf32, #tpu.memory_space<vmem>>, vector<32x128xf32>
    %c0_9 = arith.constant 0 : index
    %c0_10 = arith.constant 0 : index
    %8 = vector.load %arg5[%c0_9, %c0_10] : memref<32x128xf32, #tpu.memory_space<vmem>>, vector<32x128xf32>
    %c0_11 = arith.constant 0 : index
    %c0_12 = arith.constant 0 : index
    %9 = vector.load %arg6[%c0_11, %c0_12] : memref<1x128xf32, #tpu.memory_space<vmem>>, vector<1x128xf32>
    %10 = vector.shape_cast %9 : vector<1x128xf32> to vector<1x128xf32>
    %11 = vector.broadcast %10 : vector<1x128xf32> to vector<8x128xf32>
    %cst_13 = arith.constant 0.000000e+00 : f32
    %12 = vector.broadcast %cst_13 : f32 to vector<8x32xf32>
    %cst_14 = arith.constant dense<0.000000e+00> : vector<8x128xf32>
    %13 = tpu.matmul %12, %8, %cst_14 {dimension_numbers = #tpu.dot_dimension_numbers<[1], [0], [0], [1], [0, 0, 1, 1], [], []>} : vector<8x32xf32>, vector<32x128xf32>, vector<8x128xf32> -> vector<8x128xf32>
    %14 = vector.extract_strided_slice %5 {offsets = [0, 0], sizes = [8, 128], strides = [1, 1]} : vector<64x128xf32> to vector<8x128xf32>
    %cst_15 = arith.constant dense<0.000000e+00> : vector<8x128xf32>
    %15 = tpu.matmul %12, %6, %cst_15 {dimension_numbers = #tpu.dot_dimension_numbers<[1], [0], [0], [1], [0, 0, 1, 1], [], []>} : vector<8x32xf32>, vector<32x128xf32>, vector<8x128xf32> -> vector<8x128xf32>
    %16 = arith.addf %14, %15 : vector<8x128xf32>
    %17 = math.tanh %16 : vector<8x128xf32>
    %cst_16 = arith.constant 5.000000e-01 : f32
    %18 = vector.broadcast %cst_16 : f32 to vector<8x128xf32>
    %19 = arith.mulf %18, %17 : vector<8x128xf32>
    %cst_17 = arith.constant 5.000000e-01 : f32
    %20 = vector.broadcast %cst_17 : f32 to vector<8x128xf32>
    %21 = arith.addf %19, %20 : vector<8x128xf32>
    %22 = vector.extract_strided_slice %21 {offsets = [0, 0], sizes = [8, 32], strides = [1, 1]} : vector<8x128xf32> to vector<8x32xf32>
    %23 = vector.extract_strided_slice %21 {offsets = [0, 32], sizes = [8, 32], strides = [1, 1]} : vector<8x128xf32> to vector<8x32xf32>
    %24 = vector.extract_strided_slice %17 {offsets = [0, 64], sizes = [8, 32], strides = [1, 1]} : vector<8x128xf32> to vector<8x32xf32>
    %25 = vector.extract_strided_slice %21 {offsets = [0, 96], sizes = [8, 32], strides = [1, 1]} : vector<8x128xf32> to vector<8x32xf32>
    %26 = arith.mulf %23, %12 : vector<8x32xf32>
    %27 = arith.mulf %22, %24 : vector<8x32xf32>
    %28 = arith.addf %26, %27 : vector<8x32xf32>
    %29 = math.tanh %28 : vector<8x32xf32>
    %30 = arith.mulf %25, %29 : vector<8x32xf32>
    %cst_18 = arith.constant dense<0.000000e+00> : vector<8x128xf32>
    %31 = tpu.matmul %30, %7, %cst_18 {dimension_numbers = #tpu.dot_dimension_numbers<[1], [0], [0], [1], [0, 0, 1, 1], [], []>} : vector<8x32xf32>, vector<32x128xf32>, vector<8x128xf32> -> vector<8x128xf32>
    %32 = arith.addf %31, %13 : vector<8x128xf32>
    %33 = arith.addf %32, %11 : vector<8x128xf32>
    %34 = math.tanh %33 : vector<8x128xf32>
    %cst_19 = arith.constant 5.000000e-01 : f32
    %35 = vector.broadcast %cst_19 : f32 to vector<8x128xf32>
    %36 = arith.mulf %35, %34 : vector<8x128xf32>
    %cst_20 = arith.constant 5.000000e-01 : f32
    %37 = vector.broadcast %cst_20 : f32 to vector<8x128xf32>
    %38 = arith.addf %36, %37 : vector<8x128xf32>
    %39 = vector.extract_strided_slice %38 {offsets = [0, 0], sizes = [8, 32], strides = [1, 1]} : vector<8x128xf32> to vector<8x32xf32>
    %40 = vector.extract_strided_slice %38 {offsets = [0, 32], sizes = [8, 32], strides = [1, 1]} : vector<8x128xf32> to vector<8x32xf32>
    %41 = vector.extract_strided_slice %34 {offsets = [0, 64], sizes = [8, 32], strides = [1, 1]} : vector<8x128xf32> to vector<8x32xf32>
    %42 = vector.extract_strided_slice %38 {offsets = [0, 96], sizes = [8, 32], strides = [1, 1]} : vector<8x128xf32> to vector<8x32xf32>
    %43 = arith.mulf %40, %12 : vector<8x32xf32>
    %44 = arith.mulf %39, %41 : vector<8x32xf32>
    %45 = arith.addf %43, %44 : vector<8x32xf32>
    %46 = math.tanh %45 : vector<8x32xf32>
    %47 = arith.mulf %42, %46 : vector<8x32xf32>
    %cst_21 = arith.constant dense<0.000000e+00> : vector<8x128xf32>
    %48 = tpu.matmul %47, %8, %cst_21 {dimension_numbers = #tpu.dot_dimension_numbers<[1], [0], [0], [1], [0, 0, 1, 1], [], []>} : vector<8x32xf32>, vector<32x128xf32>, vector<8x128xf32> -> vector<8x128xf32>
    %49 = vector.extract_strided_slice %5 {offsets = [8, 0], sizes = [8, 128], strides = [1, 1]} : vector<64x128xf32> to vector<8x128xf32>
    %cst_22 = arith.constant dense<0.000000e+00> : vector<8x128xf32>
    %50 = tpu.matmul %30, %6, %cst_22 {dimension_numbers = #tpu.dot_dimension_numbers<[1], [0], [0], [1], [0, 0, 1, 1], [], []>} : vector<8x32xf32>, vector<32x128xf32>, vector<8x128xf32> -> vector<8x128xf32>
    %51 = arith.addf %49, %50 : vector<8x128xf32>
    %52 = math.tanh %51 : vector<8x128xf32>
    %cst_23 = arith.constant 5.000000e-01 : f32
    %53 = vector.broadcast %cst_23 : f32 to vector<8x128xf32>
    %54 = arith.mulf %53, %52 : vector<8x128xf32>
    %cst_24 = arith.constant 5.000000e-01 : f32
    %55 = vector.broadcast %cst_24 : f32 to vector<8x128xf32>
    %56 = arith.addf %54, %55 : vector<8x128xf32>
    %57 = vector.extract_strided_slice %56 {offsets = [0, 0], sizes = [8, 32], strides = [1, 1]} : vector<8x128xf32> to vector<8x32xf32>
    %58 = vector.extract_strided_slice %56 {offsets = [0, 32], sizes = [8, 32], strides = [1, 1]} : vector<8x128xf32> to vector<8x32xf32>
    %59 = vector.extract_strided_slice %52 {offsets = [0, 64], sizes = [8, 32], strides = [1, 1]} : vector<8x128xf32> to vector<8x32xf32>
    %60 = vector.extract_strided_slice %56 {offsets = [0, 96], sizes = [8, 32], strides = [1, 1]} : vector<8x128xf32> to vector<8x32xf32>
    %61 = arith.mulf %58, %28 : vector<8x32xf32>
    %62 = arith.mulf %57, %59 : vector<8x32xf32>
    %63 = arith.addf %61, %62 : vector<8x32xf32>
    %64 = math.tanh %63 : vector<8x32xf32>
    %65 = arith.mulf %60, %64 : vector<8x32xf32>
    %cst_25 = arith.constant dense<0.000000e+00> : vector<8x128xf32>
    %66 = tpu.matmul %65, %7, %cst_25 {dimension_numbers = #tpu.dot_dimension_numbers<[1], [0], [0], [1], [0, 0, 1, 1], [], []>} : vector<8x32xf32>, vector<32x128xf32>, vector<8x128xf32> -> vector<8x128xf32>
    %67 = arith.addf %66, %48 : vector<8x128xf32>
    %68 = arith.addf %67, %11 : vector<8x128xf32>
    %69 = math.tanh %68 : vector<8x128xf32>
    %cst_26 = arith.constant 5.000000e-01 : f32
    %70 = vector.broadcast %cst_26 : f32 to vector<8x128xf32>
    %71 = arith.mulf %70, %69 : vector<8x128xf32>
    %cst_27 = arith.constant 5.000000e-01 : f32
    %72 = vector.broadcast %cst_27 : f32 to vector<8x128xf32>
    %73 = arith.addf %71, %72 : vector<8x128xf32>
    %74 = vector.extract_strided_slice %73 {offsets = [0, 0], sizes = [8, 32], strides = [1, 1]} : vector<8x128xf32> to vector<8x32xf32>
    %75 = vector.extract_strided_slice %73 {offsets = [0, 32], sizes = [8, 32], strides = [1, 1]} : vector<8x128xf32> to vector<8x32xf32>
    %76 = vector.extract_strided_slice %69 {offsets = [0, 64], sizes = [8, 32], strides = [1, 1]} : vector<8x128xf32> to vector<8x32xf32>
    %77 = vector.extract_strided_slice %73 {offsets = [0, 96], sizes = [8, 32], strides = [1, 1]} : vector<8x128xf32> to vector<8x32xf32>
    %78 = arith.mulf %75, %45 : vector<8x32xf32>
    %79 = arith.mulf %74, %76 : vector<8x32xf32>
    %80 = arith.addf %78, %79 : vector<8x32xf32>
    %81 = math.tanh %80 : vector<8x32xf32>
    %82 = arith.mulf %77, %81 : vector<8x32xf32>
    %cst_28 = arith.constant dense<0.000000e+00> : vector<8x128xf32>
    %83 = tpu.matmul %82, %8, %cst_28 {dimension_numbers = #tpu.dot_dimension_numbers<[1], [0], [0], [1], [0, 0, 1, 1], [], []>} : vector<8x32xf32>, vector<32x128xf32>, vector<8x128xf32> -> vector<8x128xf32>
    %84 = vector.extract_strided_slice %5 {offsets = [16, 0], sizes = [8, 128], strides = [1, 1]} : vector<64x128xf32> to vector<8x128xf32>
    %cst_29 = arith.constant dense<0.000000e+00> : vector<8x128xf32>
    %85 = tpu.matmul %65, %6, %cst_29 {dimension_numbers = #tpu.dot_dimension_numbers<[1], [0], [0], [1], [0, 0, 1, 1], [], []>} : vector<8x32xf32>, vector<32x128xf32>, vector<8x128xf32> -> vector<8x128xf32>
    %86 = arith.addf %84, %85 : vector<8x128xf32>
    %87 = math.tanh %86 : vector<8x128xf32>
    %cst_30 = arith.constant 5.000000e-01 : f32
    %88 = vector.broadcast %cst_30 : f32 to vector<8x128xf32>
    %89 = arith.mulf %88, %87 : vector<8x128xf32>
    %cst_31 = arith.constant 5.000000e-01 : f32
    %90 = vector.broadcast %cst_31 : f32 to vector<8x128xf32>
    %91 = arith.addf %89, %90 : vector<8x128xf32>
    %92 = vector.extract_strided_slice %91 {offsets = [0, 0], sizes = [8, 32], strides = [1, 1]} : vector<8x128xf32> to vector<8x32xf32>
    %93 = vector.extract_strided_slice %91 {offsets = [0, 32], sizes = [8, 32], strides = [1, 1]} : vector<8x128xf32> to vector<8x32xf32>
    %94 = vector.extract_strided_slice %87 {offsets = [0, 64], sizes = [8, 32], strides = [1, 1]} : vector<8x128xf32> to vector<8x32xf32>
    %95 = vector.extract_strided_slice %91 {offsets = [0, 96], sizes = [8, 32], strides = [1, 1]} : vector<8x128xf32> to vector<8x32xf32>
    %96 = arith.mulf %93, %63 : vector<8x32xf32>
    %97 = arith.mulf %92, %94 : vector<8x32xf32>
    %98 = arith.addf %96, %97 : vector<8x32xf32>
    %99 = math.tanh %98 : vector<8x32xf32>
    %100 = arith.mulf %95, %99 : vector<8x32xf32>
    %cst_32 = arith.constant dense<0.000000e+00> : vector<8x128xf32>
    %101 = tpu.matmul %100, %7, %cst_32 {dimension_numbers = #tpu.dot_dimension_numbers<[1], [0], [0], [1], [0, 0, 1, 1], [], []>} : vector<8x32xf32>, vector<32x128xf32>, vector<8x128xf32> -> vector<8x128xf32>
    %102 = arith.addf %101, %83 : vector<8x128xf32>
    %103 = arith.addf %102, %11 : vector<8x128xf32>
    %104 = math.tanh %103 : vector<8x128xf32>
    %cst_33 = arith.constant 5.000000e-01 : f32
    %105 = vector.broadcast %cst_33 : f32 to vector<8x128xf32>
    %106 = arith.mulf %105, %104 : vector<8x128xf32>
    %cst_34 = arith.constant 5.000000e-01 : f32
    %107 = vector.broadcast %cst_34 : f32 to vector<8x128xf32>
    %108 = arith.addf %106, %107 : vector<8x128xf32>
    %109 = vector.extract_strided_slice %108 {offsets = [0, 0], sizes = [8, 32], strides = [1, 1]} : vector<8x128xf32> to vector<8x32xf32>
    %110 = vector.extract_strided_slice %108 {offsets = [0, 32], sizes = [8, 32], strides = [1, 1]} : vector<8x128xf32> to vector<8x32xf32>
    %111 = vector.extract_strided_slice %104 {offsets = [0, 64], sizes = [8, 32], strides = [1, 1]} : vector<8x128xf32> to vector<8x32xf32>
    %112 = vector.extract_strided_slice %108 {offsets = [0, 96], sizes = [8, 32], strides = [1, 1]} : vector<8x128xf32> to vector<8x32xf32>
    %113 = arith.mulf %110, %80 : vector<8x32xf32>
    %114 = arith.mulf %109, %111 : vector<8x32xf32>
    %115 = arith.addf %113, %114 : vector<8x32xf32>
    %116 = math.tanh %115 : vector<8x32xf32>
    %117 = arith.mulf %112, %116 : vector<8x32xf32>
    %cst_35 = arith.constant dense<0.000000e+00> : vector<8x128xf32>
    %118 = tpu.matmul %117, %8, %cst_35 {dimension_numbers = #tpu.dot_dimension_numbers<[1], [0], [0], [1], [0, 0, 1, 1], [], []>} : vector<8x32xf32>, vector<32x128xf32>, vector<8x128xf32> -> vector<8x128xf32>
    %119 = vector.extract_strided_slice %5 {offsets = [24, 0], sizes = [8, 128], strides = [1, 1]} : vector<64x128xf32> to vector<8x128xf32>
    %cst_36 = arith.constant dense<0.000000e+00> : vector<8x128xf32>
    %120 = tpu.matmul %100, %6, %cst_36 {dimension_numbers = #tpu.dot_dimension_numbers<[1], [0], [0], [1], [0, 0, 1, 1], [], []>} : vector<8x32xf32>, vector<32x128xf32>, vector<8x128xf32> -> vector<8x128xf32>
    %121 = arith.addf %119, %120 : vector<8x128xf32>
    %122 = math.tanh %121 : vector<8x128xf32>
    %cst_37 = arith.constant 5.000000e-01 : f32
    %123 = vector.broadcast %cst_37 : f32 to vector<8x128xf32>
    %124 = arith.mulf %123, %122 : vector<8x128xf32>
    %cst_38 = arith.constant 5.000000e-01 : f32
    %125 = vector.broadcast %cst_38 : f32 to vector<8x128xf32>
    %126 = arith.addf %124, %125 : vector<8x128xf32>
    %127 = vector.extract_strided_slice %126 {offsets = [0, 0], sizes = [8, 32], strides = [1, 1]} : vector<8x128xf32> to vector<8x32xf32>
    %128 = vector.extract_strided_slice %126 {offsets = [0, 32], sizes = [8, 32], strides = [1, 1]} : vector<8x128xf32> to vector<8x32xf32>
    %129 = vector.extract_strided_slice %122 {offsets = [0, 64], sizes = [8, 32], strides = [1, 1]} : vector<8x128xf32> to vector<8x32xf32>
    %130 = vector.extract_strided_slice %126 {offsets = [0, 96], sizes = [8, 32], strides = [1, 1]} : vector<8x128xf32> to vector<8x32xf32>
    %131 = arith.mulf %128, %98 : vector<8x32xf32>
    %132 = arith.mulf %127, %129 : vector<8x32xf32>
    %133 = arith.addf %131, %132 : vector<8x32xf32>
    %134 = math.tanh %133 : vector<8x32xf32>
    %135 = arith.mulf %130, %134 : vector<8x32xf32>
    %cst_39 = arith.constant dense<0.000000e+00> : vector<8x128xf32>
    %136 = tpu.matmul %135, %7, %cst_39 {dimension_numbers = #tpu.dot_dimension_numbers<[1], [0], [0], [1], [0, 0, 1, 1], [], []>} : vector<8x32xf32>, vector<32x128xf32>, vector<8x128xf32> -> vector<8x128xf32>
    %137 = arith.addf %136, %118 : vector<8x128xf32>
    %138 = arith.addf %137, %11 : vector<8x128xf32>
    %139 = math.tanh %138 : vector<8x128xf32>
    %cst_40 = arith.constant 5.000000e-01 : f32
    %140 = vector.broadcast %cst_40 : f32 to vector<8x128xf32>
    %141 = arith.mulf %140, %139 : vector<8x128xf32>
    %cst_41 = arith.constant 5.000000e-01 : f32
    %142 = vector.broadcast %cst_41 : f32 to vector<8x128xf32>
    %143 = arith.addf %141, %142 : vector<8x128xf32>
    %144 = vector.extract_strided_slice %143 {offsets = [0, 0], sizes = [8, 32], strides = [1, 1]} : vector<8x128xf32> to vector<8x32xf32>
    %145 = vector.extract_strided_slice %143 {offsets = [0, 32], sizes = [8, 32], strides = [1, 1]} : vector<8x128xf32> to vector<8x32xf32>
    %146 = vector.extract_strided_slice %139 {offsets = [0, 64], sizes = [8, 32], strides = [1, 1]} : vector<8x128xf32> to vector<8x32xf32>
    %147 = vector.extract_strided_slice %143 {offsets = [0, 96], sizes = [8, 32], strides = [1, 1]} : vector<8x128xf32> to vector<8x32xf32>
    %148 = arith.mulf %145, %115 : vector<8x32xf32>
    %149 = arith.mulf %144, %146 : vector<8x32xf32>
    %150 = arith.addf %148, %149 : vector<8x32xf32>
    %151 = math.tanh %150 : vector<8x32xf32>
    %152 = arith.mulf %147, %151 : vector<8x32xf32>
    %cst_42 = arith.constant dense<0.000000e+00> : vector<8x128xf32>
    %153 = tpu.matmul %152, %8, %cst_42 {dimension_numbers = #tpu.dot_dimension_numbers<[1], [0], [0], [1], [0, 0, 1, 1], [], []>} : vector<8x32xf32>, vector<32x128xf32>, vector<8x128xf32> -> vector<8x128xf32>
    %154 = vector.extract_strided_slice %5 {offsets = [32, 0], sizes = [8, 128], strides = [1, 1]} : vector<64x128xf32> to vector<8x128xf32>
    %cst_43 = arith.constant dense<0.000000e+00> : vector<8x128xf32>
    %155 = tpu.matmul %135, %6, %cst_43 {dimension_numbers = #tpu.dot_dimension_numbers<[1], [0], [0], [1], [0, 0, 1, 1], [], []>} : vector<8x32xf32>, vector<32x128xf32>, vector<8x128xf32> -> vector<8x128xf32>
    %156 = arith.addf %154, %155 : vector<8x128xf32>
    %157 = math.tanh %156 : vector<8x128xf32>
    %cst_44 = arith.constant 5.000000e-01 : f32
    %158 = vector.broadcast %cst_44 : f32 to vector<8x128xf32>
    %159 = arith.mulf %158, %157 : vector<8x128xf32>
    %cst_45 = arith.constant 5.000000e-01 : f32
    %160 = vector.broadcast %cst_45 : f32 to vector<8x128xf32>
    %161 = arith.addf %159, %160 : vector<8x128xf32>
    %162 = vector.extract_strided_slice %161 {offsets = [0, 0], sizes = [8, 32], strides = [1, 1]} : vector<8x128xf32> to vector<8x32xf32>
    %163 = vector.extract_strided_slice %161 {offsets = [0, 32], sizes = [8, 32], strides = [1, 1]} : vector<8x128xf32> to vector<8x32xf32>
    %164 = vector.extract_strided_slice %157 {offsets = [0, 64], sizes = [8, 32], strides = [1, 1]} : vector<8x128xf32> to vector<8x32xf32>
    %165 = vector.extract_strided_slice %161 {offsets = [0, 96], sizes = [8, 32], strides = [1, 1]} : vector<8x128xf32> to vector<8x32xf32>
    %166 = arith.mulf %163, %133 : vector<8x32xf32>
    %167 = arith.mulf %162, %164 : vector<8x32xf32>
    %168 = arith.addf %166, %167 : vector<8x32xf32>
    %169 = math.tanh %168 : vector<8x32xf32>
    %170 = arith.mulf %165, %169 : vector<8x32xf32>
    %cst_46 = arith.constant dense<0.000000e+00> : vector<8x128xf32>
    %171 = tpu.matmul %170, %7, %cst_46 {dimension_numbers = #tpu.dot_dimension_numbers<[1], [0], [0], [1], [0, 0, 1, 1], [], []>} : vector<8x32xf32>, vector<32x128xf32>, vector<8x128xf32> -> vector<8x128xf32>
    %172 = arith.addf %171, %153 : vector<8x128xf32>
    %173 = arith.addf %172, %11 : vector<8x128xf32>
    %174 = math.tanh %173 : vector<8x128xf32>
    %cst_47 = arith.constant 5.000000e-01 : f32
    %175 = vector.broadcast %cst_47 : f32 to vector<8x128xf32>
    %176 = arith.mulf %175, %174 : vector<8x128xf32>
    %cst_48 = arith.constant 5.000000e-01 : f32
    %177 = vector.broadcast %cst_48 : f32 to vector<8x128xf32>
    %178 = arith.addf %176, %177 : vector<8x128xf32>
    %179 = vector.extract_strided_slice %178 {offsets = [0, 0], sizes = [8, 32], strides = [1, 1]} : vector<8x128xf32> to vector<8x32xf32>
    %180 = vector.extract_strided_slice %178 {offsets = [0, 32], sizes = [8, 32], strides = [1, 1]} : vector<8x128xf32> to vector<8x32xf32>
    %181 = vector.extract_strided_slice %174 {offsets = [0, 64], sizes = [8, 32], strides = [1, 1]} : vector<8x128xf32> to vector<8x32xf32>
    %182 = vector.extract_strided_slice %178 {offsets = [0, 96], sizes = [8, 32], strides = [1, 1]} : vector<8x128xf32> to vector<8x32xf32>
    %183 = arith.mulf %180, %150 : vector<8x32xf32>
    %184 = arith.mulf %179, %181 : vector<8x32xf32>
    %185 = arith.addf %183, %184 : vector<8x32xf32>
    %186 = math.tanh %185 : vector<8x32xf32>
    %187 = arith.mulf %182, %186 : vector<8x32xf32>
    %cst_49 = arith.constant dense<0.000000e+00> : vector<8x128xf32>
    %188 = tpu.matmul %187, %8, %cst_49 {dimension_numbers = #tpu.dot_dimension_numbers<[1], [0], [0], [1], [0, 0, 1, 1], [], []>} : vector<8x32xf32>, vector<32x128xf32>, vector<8x128xf32> -> vector<8x128xf32>
    %189 = vector.extract_strided_slice %5 {offsets = [40, 0], sizes = [8, 128], strides = [1, 1]} : vector<64x128xf32> to vector<8x128xf32>
    %cst_50 = arith.constant dense<0.000000e+00> : vector<8x128xf32>
    %190 = tpu.matmul %170, %6, %cst_50 {dimension_numbers = #tpu.dot_dimension_numbers<[1], [0], [0], [1], [0, 0, 1, 1], [], []>} : vector<8x32xf32>, vector<32x128xf32>, vector<8x128xf32> -> vector<8x128xf32>
    %191 = arith.addf %189, %190 : vector<8x128xf32>
    %192 = math.tanh %191 : vector<8x128xf32>
    %cst_51 = arith.constant 5.000000e-01 : f32
    %193 = vector.broadcast %cst_51 : f32 to vector<8x128xf32>
    %194 = arith.mulf %193, %192 : vector<8x128xf32>
    %cst_52 = arith.constant 5.000000e-01 : f32
    %195 = vector.broadcast %cst_52 : f32 to vector<8x128xf32>
    %196 = arith.addf %194, %195 : vector<8x128xf32>
    %197 = vector.extract_strided_slice %196 {offsets = [0, 0], sizes = [8, 32], strides = [1, 1]} : vector<8x128xf32> to vector<8x32xf32>
    %198 = vector.extract_strided_slice %196 {offsets = [0, 32], sizes = [8, 32], strides = [1, 1]} : vector<8x128xf32> to vector<8x32xf32>
    %199 = vector.extract_strided_slice %192 {offsets = [0, 64], sizes = [8, 32], strides = [1, 1]} : vector<8x128xf32> to vector<8x32xf32>
    %200 = vector.extract_strided_slice %196 {offsets = [0, 96], sizes = [8, 32], strides = [1, 1]} : vector<8x128xf32> to vector<8x32xf32>
    %201 = arith.mulf %198, %168 : vector<8x32xf32>
    %202 = arith.mulf %197, %199 : vector<8x32xf32>
    %203 = arith.addf %201, %202 : vector<8x32xf32>
    %204 = math.tanh %203 : vector<8x32xf32>
    %205 = arith.mulf %200, %204 : vector<8x32xf32>
    %cst_53 = arith.constant dense<0.000000e+00> : vector<8x128xf32>
    %206 = tpu.matmul %205, %7, %cst_53 {dimension_numbers = #tpu.dot_dimension_numbers<[1], [0], [0], [1], [0, 0, 1, 1], [], []>} : vector<8x32xf32>, vector<32x128xf32>, vector<8x128xf32> -> vector<8x128xf32>
    %207 = arith.addf %206, %188 : vector<8x128xf32>
    %208 = arith.addf %207, %11 : vector<8x128xf32>
    %209 = math.tanh %208 : vector<8x128xf32>
    %cst_54 = arith.constant 5.000000e-01 : f32
    %210 = vector.broadcast %cst_54 : f32 to vector<8x128xf32>
    %211 = arith.mulf %210, %209 : vector<8x128xf32>
    %cst_55 = arith.constant 5.000000e-01 : f32
    %212 = vector.broadcast %cst_55 : f32 to vector<8x128xf32>
    %213 = arith.addf %211, %212 : vector<8x128xf32>
    %214 = vector.extract_strided_slice %213 {offsets = [0, 0], sizes = [8, 32], strides = [1, 1]} : vector<8x128xf32> to vector<8x32xf32>
    %215 = vector.extract_strided_slice %213 {offsets = [0, 32], sizes = [8, 32], strides = [1, 1]} : vector<8x128xf32> to vector<8x32xf32>
    %216 = vector.extract_strided_slice %209 {offsets = [0, 64], sizes = [8, 32], strides = [1, 1]} : vector<8x128xf32> to vector<8x32xf32>
    %217 = vector.extract_strided_slice %213 {offsets = [0, 96], sizes = [8, 32], strides = [1, 1]} : vector<8x128xf32> to vector<8x32xf32>
    %218 = arith.mulf %215, %185 : vector<8x32xf32>
    %219 = arith.mulf %214, %216 : vector<8x32xf32>
    %220 = arith.addf %218, %219 : vector<8x32xf32>
    %221 = math.tanh %220 : vector<8x32xf32>
    %222 = arith.mulf %217, %221 : vector<8x32xf32>
    %cst_56 = arith.constant dense<0.000000e+00> : vector<8x128xf32>
    %223 = tpu.matmul %222, %8, %cst_56 {dimension_numbers = #tpu.dot_dimension_numbers<[1], [0], [0], [1], [0, 0, 1, 1], [], []>} : vector<8x32xf32>, vector<32x128xf32>, vector<8x128xf32> -> vector<8x128xf32>
    %224 = vector.extract_strided_slice %5 {offsets = [48, 0], sizes = [8, 128], strides = [1, 1]} : vector<64x128xf32> to vector<8x128xf32>
    %cst_57 = arith.constant dense<0.000000e+00> : vector<8x128xf32>
    %225 = tpu.matmul %205, %6, %cst_57 {dimension_numbers = #tpu.dot_dimension_numbers<[1], [0], [0], [1], [0, 0, 1, 1], [], []>} : vector<8x32xf32>, vector<32x128xf32>, vector<8x128xf32> -> vector<8x128xf32>
    %226 = arith.addf %224, %225 : vector<8x128xf32>
    %227 = math.tanh %226 : vector<8x128xf32>
    %cst_58 = arith.constant 5.000000e-01 : f32
    %228 = vector.broadcast %cst_58 : f32 to vector<8x128xf32>
    %229 = arith.mulf %228, %227 : vector<8x128xf32>
    %cst_59 = arith.constant 5.000000e-01 : f32
    %230 = vector.broadcast %cst_59 : f32 to vector<8x128xf32>
    %231 = arith.addf %229, %230 : vector<8x128xf32>
    %232 = vector.extract_strided_slice %231 {offsets = [0, 0], sizes = [8, 32], strides = [1, 1]} : vector<8x128xf32> to vector<8x32xf32>
    %233 = vector.extract_strided_slice %231 {offsets = [0, 32], sizes = [8, 32], strides = [1, 1]} : vector<8x128xf32> to vector<8x32xf32>
    %234 = vector.extract_strided_slice %227 {offsets = [0, 64], sizes = [8, 32], strides = [1, 1]} : vector<8x128xf32> to vector<8x32xf32>
    %235 = vector.extract_strided_slice %231 {offsets = [0, 96], sizes = [8, 32], strides = [1, 1]} : vector<8x128xf32> to vector<8x32xf32>
    %236 = arith.mulf %233, %203 : vector<8x32xf32>
    %237 = arith.mulf %232, %234 : vector<8x32xf32>
    %238 = arith.addf %236, %237 : vector<8x32xf32>
    %239 = math.tanh %238 : vector<8x32xf32>
    %240 = arith.mulf %235, %239 : vector<8x32xf32>
    %cst_60 = arith.constant dense<0.000000e+00> : vector<8x128xf32>
    %241 = tpu.matmul %240, %7, %cst_60 {dimension_numbers = #tpu.dot_dimension_numbers<[1], [0], [0], [1], [0, 0, 1, 1], [], []>} : vector<8x32xf32>, vector<32x128xf32>, vector<8x128xf32> -> vector<8x128xf32>
    %242 = arith.addf %241, %223 : vector<8x128xf32>
    %243 = arith.addf %242, %11 : vector<8x128xf32>
    %244 = math.tanh %243 : vector<8x128xf32>
    %cst_61 = arith.constant 5.000000e-01 : f32
    %245 = vector.broadcast %cst_61 : f32 to vector<8x128xf32>
    %246 = arith.mulf %245, %244 : vector<8x128xf32>
    %cst_62 = arith.constant 5.000000e-01 : f32
    %247 = vector.broadcast %cst_62 : f32 to vector<8x128xf32>
    %248 = arith.addf %246, %247 : vector<8x128xf32>
    %249 = vector.extract_strided_slice %248 {offsets = [0, 0], sizes = [8, 32], strides = [1, 1]} : vector<8x128xf32> to vector<8x32xf32>
    %250 = vector.extract_strided_slice %248 {offsets = [0, 32], sizes = [8, 32], strides = [1, 1]} : vector<8x128xf32> to vector<8x32xf32>
    %251 = vector.extract_strided_slice %244 {offsets = [0, 64], sizes = [8, 32], strides = [1, 1]} : vector<8x128xf32> to vector<8x32xf32>
    %252 = vector.extract_strided_slice %248 {offsets = [0, 96], sizes = [8, 32], strides = [1, 1]} : vector<8x128xf32> to vector<8x32xf32>
    %253 = arith.mulf %250, %220 : vector<8x32xf32>
    %254 = arith.mulf %249, %251 : vector<8x32xf32>
    %255 = arith.addf %253, %254 : vector<8x32xf32>
    %256 = math.tanh %255 : vector<8x32xf32>
    %257 = arith.mulf %252, %256 : vector<8x32xf32>
    %cst_63 = arith.constant dense<0.000000e+00> : vector<8x128xf32>
    %258 = tpu.matmul %257, %8, %cst_63 {dimension_numbers = #tpu.dot_dimension_numbers<[1], [0], [0], [1], [0, 0, 1, 1], [], []>} : vector<8x32xf32>, vector<32x128xf32>, vector<8x128xf32> -> vector<8x128xf32>
    %259 = vector.extract_strided_slice %5 {offsets = [56, 0], sizes = [8, 128], strides = [1, 1]} : vector<64x128xf32> to vector<8x128xf32>
    %cst_64 = arith.constant dense<0.000000e+00> : vector<8x128xf32>
    %260 = tpu.matmul %240, %6, %cst_64 {dimension_numbers = #tpu.dot_dimension_numbers<[1], [0], [0], [1], [0, 0, 1, 1], [], []>} : vector<8x32xf32>, vector<32x128xf32>, vector<8x128xf32> -> vector<8x128xf32>
    %261 = arith.addf %259, %260 : vector<8x128xf32>
    %262 = math.tanh %261 : vector<8x128xf32>
    %cst_65 = arith.constant 5.000000e-01 : f32
    %263 = vector.broadcast %cst_65 : f32 to vector<8x128xf32>
    %264 = arith.mulf %263, %262 : vector<8x128xf32>
    %cst_66 = arith.constant 5.000000e-01 : f32
    %265 = vector.broadcast %cst_66 : f32 to vector<8x128xf32>
    %266 = arith.addf %264, %265 : vector<8x128xf32>
    %267 = vector.extract_strided_slice %266 {offsets = [0, 0], sizes = [8, 32], strides = [1, 1]} : vector<8x128xf32> to vector<8x32xf32>
    %268 = vector.extract_strided_slice %266 {offsets = [0, 32], sizes = [8, 32], strides = [1, 1]} : vector<8x128xf32> to vector<8x32xf32>
    %269 = vector.extract_strided_slice %262 {offsets = [0, 64], sizes = [8, 32], strides = [1, 1]} : vector<8x128xf32> to vector<8x32xf32>
    %270 = vector.extract_strided_slice %266 {offsets = [0, 96], sizes = [8, 32], strides = [1, 1]} : vector<8x128xf32> to vector<8x32xf32>
    %271 = arith.mulf %268, %238 : vector<8x32xf32>
    %272 = arith.mulf %267, %269 : vector<8x32xf32>
    %273 = arith.addf %271, %272 : vector<8x32xf32>
    %274 = math.tanh %273 : vector<8x32xf32>
    %275 = arith.mulf %270, %274 : vector<8x32xf32>
    %cst_67 = arith.constant dense<0.000000e+00> : vector<8x128xf32>
    %276 = tpu.matmul %275, %7, %cst_67 {dimension_numbers = #tpu.dot_dimension_numbers<[1], [0], [0], [1], [0, 0, 1, 1], [], []>} : vector<8x32xf32>, vector<32x128xf32>, vector<8x128xf32> -> vector<8x128xf32>
    %277 = arith.addf %276, %258 : vector<8x128xf32>
    %278 = arith.addf %277, %11 : vector<8x128xf32>
    %279 = math.tanh %278 : vector<8x128xf32>
    %cst_68 = arith.constant 5.000000e-01 : f32
    %280 = vector.broadcast %cst_68 : f32 to vector<8x128xf32>
    %281 = arith.mulf %280, %279 : vector<8x128xf32>
    %cst_69 = arith.constant 5.000000e-01 : f32
    %282 = vector.broadcast %cst_69 : f32 to vector<8x128xf32>
    %283 = arith.addf %281, %282 : vector<8x128xf32>
    %284 = vector.extract_strided_slice %283 {offsets = [0, 0], sizes = [8, 32], strides = [1, 1]} : vector<8x128xf32> to vector<8x32xf32>
    %285 = vector.extract_strided_slice %283 {offsets = [0, 32], sizes = [8, 32], strides = [1, 1]} : vector<8x128xf32> to vector<8x32xf32>
    %286 = vector.extract_strided_slice %279 {offsets = [0, 64], sizes = [8, 32], strides = [1, 1]} : vector<8x128xf32> to vector<8x32xf32>
    %287 = vector.extract_strided_slice %283 {offsets = [0, 96], sizes = [8, 32], strides = [1, 1]} : vector<8x128xf32> to vector<8x32xf32>
    %288 = arith.mulf %285, %255 : vector<8x32xf32>
    %289 = arith.mulf %284, %286 : vector<8x32xf32>
    %290 = arith.addf %288, %289 : vector<8x32xf32>
    %291 = math.tanh %290 : vector<8x32xf32>
    %292 = arith.mulf %287, %291 : vector<8x32xf32>
    %293 = vector.extract_strided_slice %292 {offsets = [0, 0], sizes = [2, 32], strides = [1, 1]} : vector<8x32xf32> to vector<2x32xf32>
    %c0_70 = arith.constant 0 : index
    %c0_71 = arith.constant 0 : index
    %294 = vector.load %arg7[%c0_70, %c0_71] : memref<2x32xf32, #tpu.memory_space<vmem>>, vector<2x32xf32>
    tpu.vector_store %arg7[%c0_70, %c0_71], %293 {strides = array<i32>} : memref<2x32xf32, #tpu.memory_space<vmem>>, vector<2x32xf32>,
    return
  }
}

</mosaic_0001>

<bundles_post_ra>
// kernel: tpu_custom_call.1
= control target key start
LH: loop header
LB: loop body
LE: loop exit
PB: predicated region body
PF: predicated region fallthrough
CT: control target
= control target key end

     0   :  { %12 = vsyncpa [#allocation3], 0  ;;  %s3476_s0 = inlined_call_operand.vmem [shape: f32[64,6], index: 0, kind: input, shape index: {}]   ;;  %s3477_s1 = inlined_call_operand.vmem [shape: f32[6,128], index: 1, kind: input, shape index: {}]   ;;  %s3478_s2 = inlined_call_operand.vmem [shape: f32[32,128], index: 2, kind: input, shape index: {}]   ;;  %s3479_s3 = inlined_call_operand.vmem [shape: f32[1,128], index: 3, kind: input, shape index: {}]   ;;  %s3480_s4 = inlined_call_operand.vmem [shape: f32[32,128], index: 4, kind: input, shape index: {}]   ;;  %s3481_s5 = inlined_call_operand.hbm [shape: f32[32,128], index: 5, kind: input, shape index: {}]   ;;  %s3482_s6 = inlined_call_operand.vmem [shape: f32[1,128], index: 6, kind: input, shape index: {}]   ;;  %s3483_s7 = inlined_call_operand.hbm [shape: f32[2,32], index: 7, kind: output, shape index: {}]  }
   0x1   :  { %13 = vsyncpa [#allocation4], 0  ;;  %s2891_s24 = smov [#allocation2]  }
   0x2   :  { %s29_s25 = sshll.u32 %s2891_s24, 4  ;;  %s30_s25 = int_to_ptr.vmem [resolvable:$true] %s29_s25 }
   0x3   :  { %s2855_s26 = scalar_lea.vmem %s30_s25, 512  ;;  %p2860_p1 = scmp.lt.s32.totalorder %s30_s25, %s30_s25 }
   0x4   :  { %p2856_p0 = scmp.ne.s32.totalorder %s30_s25, %s2855_s26  ;;  %p2861_p2 = scmp.lt.s32.totalorder %s2855_s26, %s2855_s26 }
   0x6   :  { %p2862_p3 = por %p2861_p2, %p2860_p1 }
   0x8   :  { %p2863_p4 = pnand %p2862_p3, %p2856_p0 }
   0xa   :  { %2866 = shalt.err (!%p2863_p4)
}
   0xb   :  { %s2892_s27 = smov 128   ;;  %s2893_s28 = smov 8  }
   0xc   :  { %35 = dma.hbm_to_vmem [thread:$0]  %s3481_s5, 512, %s30_s25, [#allocation3], %s2892_s27, %s2892_s27, %s2893_s28  }
   0xd   :  { %2887 = dma.done.wait [#allocation3], 512  }
   0xe   :  { %2888 = vsyncadd [#allocation3], 4294966784  ;;  %v2894_v0 = vmov 0.0   ;;  %vm2895_vm0 = vmmov 0   ;;  %vm82_vm1 = vcmask 1045504   ;;  %v2945_v1 = vld [vmem:[#allocation2 + $0x18] sm:$0xff] }
   0xf   :  { %2502 = vmatprep.subr.mxu1 %v2894_v0  ;;  %2510 = vmatprep.mubr.msk.f32.mxu1 %vm2895_vm0, %v2894_v0  ;;  %v2947_v2 = vld [vmem:[#allocation2 + $0x10] sm:$0xff]  ;;  %v49_v3 = vld [vmem:[%s3477_s1] sm:$0x3f]  ;;  %vm57_vm2 = vcmask 48128   ;;  %v2957_v5 = vld [vmem:[#allocation2 + $0x8] sm:$0xff]  ;;  %s2896_s22 = smov 64  }
  0x10   :  { %2503 = vmatpush3.msra.mxu1 %v2945_v1  ;;  %v41_v4 = vld [vmem:[%s3476_s0] sm:$0xff]  ;;  %2488 = vmatprep.subr.msk.mxu0 %vm82_vm1, %v49_v3  ;;  %v42_v6 = vld [vmem:[%s3476_s0 + $0x8] sm:$0xff]  ;;  %v2973_v8 = vld [vmem:[%s3478_s2 + $0x18] sm:$0xff]  ;;  %s2897_s23 = smov 32   ;;  %vm210_vm3 = vcmask 261120   ;;  %vm2309_vm4 = vcmask 254976  }
  0x11   :  { %2504 = vmatprep.subr.mxu1 %v2894_v0  ;;  %2489 = vmatpush3.msk.msra.mxu0 %vm82_vm1, %v49_v3  ;;  %v2964_v7 = vld [vmem:[#allocation2] sm:$0xff]  ;;  %v2982_v9 = vld [vmem:[%s3478_s2 + $0x10] sm:$0xff]  ;;  %v2991_v10 = vld [vmem:[%s3478_s2 + $0x8] sm:$0xff] }
  0x12   :  { %2505 = vmatpush3.msra.mxu1 %v2947_v2  ;;  %2490 = vmatprep.mubr.msk.f32.mxu0 %vm57_vm2, %v41_v4  ;;  %v2998_v11 = vld [vmem:[%s3478_s2] sm:$0xff]  ;;  %v3033_v29 = vld [vmem:[%s3480_s4 + $0x18] sm:$0xff]  ;;  %v43_v30 = vld [vmem:[%s3476_s0 + $0x10] sm:$0xff] }
  0x13   :  { %2506 = vmatprep.subr.mxu1 %v2894_v0  ;;  %2491 = vmatmul.mubr.msk.f32.vlgmr.msra.gmra.mxu0 %vm57_vm2, %v42_v6  ;;  %v3022_v15 = vld [vmem:[%s3479_s3] ss:$0 sm:$0xff]  ;;  %v44_v31 = vld [vmem:[%s3476_s0 + $0x18] sm:$0xff]  ;;  %v3046_v32 = vld [vmem:[%s3480_s4 + $0x10] sm:$0xff] }
  0x14   :  { %2507 = vmatpush3.msra.mxu1 %v2957_v5  ;;  %2524 = vmatprep.subr.mxu0 %v2894_v0  ;;  %v45_v33 = vld [vmem:[%s3476_s0 + $0x20] sm:$0xff]  ;;  %v3056_v34 = vld [vmem:[%s3480_s4 + $0x8] sm:$0xff]  ;;  %v47_v36 = vld [vmem:[%s3476_s0 + $0x30] sm:$0xff] }
  0x15   :  { %2508 = vmatprep.subr.mxu1 %v2894_v0  ;;  %2525 = vmatpush3.msra.mxu0 %v3033_v29  ;;  %v46_v35 = vld [vmem:[%s3476_s0 + $0x28] sm:$0xff]  ;;  %v3070_v37 = vld [vmem:[%s3480_s4] sm:$0xff]  ;;  %v48_v38 = vld [vmem:[%s3476_s0 + $0x38] sm:$0xff] }
  0x16   :  { %2509 = vmatpush3.msra.mxu1 %v2964_v7  ;;  %2493 = vmatprep.mubr.msk.f32.mxu0 %vm57_vm2, %v43_v30  ;;  %v3123_v49 = vld [vmem:[%s3482_s6] ss:$0 sm:$0xff] }
  0x17   :  { %2511 = vmatmul.mubr.f32.vlgmr.msra.gmra.mxu1 %v2894_v0  ;;  %2513 = vmatprep.subr.mxu1 %v2894_v0 }
  0x18   :  { %2514 = vmatpush3.msra.mxu1 %v2973_v8  ;;  %2521 = vmatprep.mubr.msk.f32.mxu1 %vm2895_vm0, %v2894_v0 }
  0x19   :  { %2515 = vmatprep.subr.mxu1 %v2894_v0  ;;  %2494 = vmatmul.mubr.msk.f32.gmra.mxu0 %vm57_vm2, %v44_v31 }
  0x1a   :  { %2516 = vmatpush3.msra.mxu1 %v2982_v9  ;;  %2526 = vmatprep.subr.mxu0 %v2894_v0 }
  0x1b   :  { %2517 = vmatprep.subr.mxu1 %v2894_v0  ;;  %2527 = vmatpush3.msra.mxu0 %v3046_v32 }
  0x1c   :  { %2518 = vmatpush3.msra.mxu1 %v2991_v10  ;;  %2496 = vmatprep.mubr.msk.f32.mxu0 %vm57_vm2, %v45_v33 }
  0x1d   :  { %2519 = vmatprep.subr.mxu1 %v2894_v0  ;;  %2528 = vmatprep.subr.mxu0 %v2894_v0 }
  0x1e   :  { %2520 = vmatpush3.msra.mxu1 %v2998_v11  ;;  %2529 = vmatpush3.msra.mxu0 %v3056_v34 }
  0x1f   :  { %2522 = vmatmul.mubr.f32.vlgmr.msra.gmra.mxu1 %v2894_v0  ;;  %2535 = vmatprep.subr.mxu1 %v2894_v0 }
  0x20   :  { %2536 = vmatpush3.msra.mxu1 %v2945_v1  ;;  %2543 = vmatprep.mubr.msk.f32.mxu1 %vm2895_vm0, %v2894_v0 }
  0x21   :  { %2537 = vmatprep.subr.mxu1 %v2894_v0  ;;  %2497 = vmatmul.mubr.msk.f32.gmra.mxu0 %vm57_vm2, %v46_v35 }
  0x22   :  { %2538 = vmatpush3.msra.mxu1 %v2947_v2  ;;  %2530 = vmatprep.subr.mxu0 %v2894_v0 }
  0x23   :  { %2539 = vmatprep.subr.mxu1 %v2894_v0  ;;  %2499 = vmatprep.mubr.msk.f32.mxu0 %vm57_vm2, %v47_v36 }
  0x24   :  { %2540 = vmatpush3.msra.mxu1 %v2957_v5  ;;  %2531 = vmatpush3.msra.mxu0 %v3070_v37 }
  0x25   :  { %2541 = vmatprep.subr.mxu1 %v2894_v0  ;;  %2546 = vmatprep.subr.mxu0 %v2894_v0 }
  0x26   :  { %2542 = vmatpush3.msra.mxu1 %v2964_v7  ;;  %2500 = vmatmul.mubr.msk.f32.gmra.mxu0 %vm57_vm2, %v48_v38 }
  0x27   :  { %2557 = vmatprep.subr.mxu1 %v2894_v0  ;;  %2532 = vmatprep.mubr.msk.f32.mxu0 %vm2895_vm0, %v2894_v0 }
  0xd3   :  { %v3017_v13 = vpop.f32.mrf.mxu0 }
  0xd4   :  { %v158_v54 = vadd.f32 %v3017_v13, %v3022_v15 }
  0xd5   :  { %v152_v16 = vpop.f32.mrf.mxu0 }
  0xd6   :  { %v153_v17 = vadd.f32 %v3022_v15, %v152_v16 }
  0xd7   :  { %v3015_v12 = vpop.f32.mrf.mxu1 }
  0xd9   :  { %v2512_v14 = vpop.f32.mrf.mxu1  ;;  %v3108_v43 = vpop.f32.mrf.mxu0 }
  0xdb   :  { %v3110_v44 = vpop.f32.mrf.mxu0 }
  0xdc   :  { %v163_v38 = vadd.f32 %v3022_v15, %v3110_v44 }
  0xdf   :  { %v350_v18 = vpop.f32.mrf.mxu1 }
  0xe0   :  { %v354_v19 = vadd.f32 %v350_v18, %v153_v17 }
  0xe1   :  { %v2523_v20 = vpop.f32.mrf.mxu1  ;;  %v3112_v45 = vpop.f32.mrf.mxu0 }
  0xe2   :  { %2774 = vtanh.f32 %v354_v19 }
  0xe3   :  { %v3114_v46 = vpop.f32.mrf.mxu0 }
  0xe6   :  { %v3116_v47 = vpop.f32.mrf.mxu0 }
  0xe8   :  { %v3118_v48 = vpop.f32.mrf.mxu0 }
  0xef   :  { %v2775_v21 = vpop.eup %2774 }
  0xf0   :  { %360 = vrot.lane.b32.xlu0 %v2775_v21, %s2896_s22  ;;  %v356_v22 = vmul.f32 0.5, %v2775_v21 }
  0xf2   :  { %v357_v23 = vadd.f32 0.5, %v356_v22 }
  0xf4   :  { %v358_v26 = vmul.f32 0.0, %v357_v23 }
 0x162   :  { %v361_v24 = vpop.permute.xlu0 %360 }
 0x163   :  { %v363_v25 = vmul.f32 %v361_v24, %v357_v23 }
 0x165   :  { %365 = vrot.lane.b32.xlu0 %v363_v25, %s2897_s23 }
 0x1d7   :  { %v366_v27 = vpop.permute.xlu0 %365 }
 0x1d8   :  { %v3027_v28 = vadd.f32 %v366_v27, %v358_v26 }
 0x1da   :  { %2776 = vtanh.f32 %v3027_v28 }
 0x1e7   :  { %v2777_v39 = vpop.eup %2776 }
 0x1e8   :  { %371 = vrot.lane.b32.xlu1 %v2777_v39, %s2896_s22 }
 0x25a   :  { %v372_v40 = vpop.permute.xlu1 %371 }
 0x25b   :  { %v374_v41 = vmul.f32 %v372_v40, %v357_v23 }
 0x25d   :  { %376 = vrot.lane.b32.xlu1 %v374_v41, %s2897_s23 }
 0x2cf   :  { %v377_v42 = vpop.permute.xlu1 %376 }
 0x2d0   :  { %2533 = vmatmul.mubr.msk.f32.vlgmr.msra.gmra.mxu0 %vm210_vm3, %v377_v42 }
 0x2d1   :  { %2547 = vmatpush3.msra.mxu0 %v2973_v8  ;;  %2554 = vmatprep.mubr.msk.f32.mxu0 %vm2895_vm0, %v2894_v0 }
 0x2d2   :  { %2548 = vmatprep.subr.mxu0 %v2894_v0 }
 0x2d3   :  { %2549 = vmatpush3.msra.mxu0 %v2982_v9 }
 0x2d4   :  { %2550 = vmatprep.subr.mxu0 %v2894_v0 }
 0x2d5   :  { %2551 = vmatpush3.msra.mxu0 %v2991_v10 }
 0x2d6   :  { %2552 = vmatprep.subr.mxu0 %v2894_v0 }
 0x2d7   :  { %2553 = vmatpush3.msra.mxu0 %v2998_v11 }
 0x2d8   :  { %2555 = vmatmul.mubr.msk.f32.vlgmr.msra.gmra.mxu0 %vm210_vm3, %v377_v42  ;;  %2568 = vmatprep.subr.mxu0 %v2894_v0 }
 0x2d9   :  { %2569 = vmatpush3.msra.mxu0 %v2945_v1  ;;  %2576 = vmatprep.mubr.msk.f32.mxu0 %vm2895_vm0, %v2894_v0 }
 0x2da   :  { %2570 = vmatprep.subr.mxu0 %v2894_v0 }
 0x2db   :  { %2571 = vmatpush3.msra.mxu0 %v2947_v2 }
 0x2dc   :  { %2572 = vmatprep.subr.mxu0 %v2894_v0 }
 0x2dd   :  { %2573 = vmatpush3.msra.mxu0 %v2957_v5 }
 0x2de   :  { %2574 = vmatprep.subr.mxu0 %v2894_v0 }
 0x2df   :  { %2575 = vmatpush3.msra.mxu0 %v2964_v7 }
 0x2e0   :  { %2590 = vmatprep.subr.mxu0 %v2894_v0 }
 0x390   :  { %v446_v50 = vpop.f32.mrf.mxu0 }
 0x391   :  { %v447_v51 = vadd.f32 %v446_v50, %v3015_v12 }
 0x392   :  { %v2534_v52 = vpop.f32.mrf.mxu0 }
 0x393   :  { %v450_v53 = vadd.f32 %v3123_v49, %v447_v51 }
 0x395   :  { %2778 = vtanh.f32 %v450_v53 }
 0x398   :  { %v612_v55 = vpop.f32.mrf.mxu0 }
 0x399   :  { %v616_v56 = vadd.f32 %v612_v55, %v158_v54 }
 0x39a   :  { %v2556_v57 = vpop.f32.mrf.mxu0 }
 0x39b   :  { %2780 = vtanh.f32 %v616_v56 }
 0x3a2   :  { %v2779_v58 = vpop.eup %2778 }
 0x3a3   :  { %456 = vrot.lane.b32.xlu0 %v2779_v58, %s2896_s22  ;;  %v452_v60 = vmul.f32 0.5, %v2779_v58 }
 0x3a5   :  { %v453_v61 = vadd.f32 0.5, %v452_v60 }
 0x3a7   :  { %v454_v13 = vmul.f32 0.0, %v453_v61 }
 0x3a8   :  { %v2781_v59 = vpop.eup %2780 }
 0x3a9   :  { %622 = vrot.lane.b32.xlu1 %v2781_v59, %s2896_s22  ;;  %v618_v3 = vmul.f32 0.5, %v2781_v59 }
 0x3ab   :  { %v619_v4 = vadd.f32 0.5, %v618_v3 }
 0x3ad   :  { %v620_v17 = vmul.f32 %v619_v4, %v3027_v28 }
 0x415   :  { %v457_v62 = vpop.permute.xlu0 %456 }
 0x416   :  { %v459_v63 = vmul.f32 %v457_v62, %v453_v61 }
 0x418   :  { %461 = vrot.lane.b32.xlu0 %v459_v63, %s2897_s23 }
 0x41b   :  { %v623_v6 = vpop.permute.xlu1 %622 }
 0x41c   :  { %v625_v12 = vmul.f32 %v623_v6, %v619_v4 }
 0x41e   :  { %627 = vrot.lane.b32.xlu1 %v625_v12, %s2897_s23 }
 0x48a   :  { %v462_v14 = vpop.permute.xlu0 %461 }
 0x48b   :  { %v3133_v16 = vadd.f32 %v462_v14, %v454_v13 }
 0x48d   :  { %2782 = vtanh.f32 %v3133_v16 }
 0x490   :  { %v628_v18 = vpop.permute.xlu1 %627 }
 0x491   :  { %v3137_v19 = vadd.f32 %v628_v18, %v620_v17 }
 0x493   :  { %2784 = vtanh.f32 %v3137_v19 }
 0x49a   :  { %v2783_v20 = vpop.eup %2782 }
 0x49b   :  { %467 = vrot.lane.b32.xlu0 %v2783_v20, %s2896_s22 }
 0x4a0   :  { %v2785_v21 = vpop.eup %2784 }
 0x4a1   :  { %633 = vrot.lane.b32.xlu1 %v2785_v21, %s2896_s22 }
 0x50d   :  { %v468_v22 = vpop.permute.xlu0 %467 }
 0x50e   :  { %v470_v23 = vmul.f32 %v468_v22, %v453_v61 }
 0x510   :  { %472 = vrot.lane.b32.xlu0 %v470_v23, %s2897_s23 }
 0x513   :  { %v634_v24 = vpop.permute.xlu1 %633 }
 0x514   :  { %v636_v25 = vmul.f32 %v634_v24, %v619_v4  ;;  %v168_v24 = vadd.f32 %v3108_v43, %v3022_v15 }
 0x516   :  { %638 = vrot.lane.b32.xlu1 %v636_v25, %s2897_s23 }
 0x582   :  { %v473_v26 = vpop.permute.xlu0 %472 }
 0x583   :  { %2544 = vmatmul.mubr.msk.f32.vlgmr.msra.gmra.mxu1 %vm210_vm3, %v473_v26 }
 0x584   :  { %2558 = vmatpush3.msra.mxu1 %v3033_v29  ;;  %2565 = vmatprep.mubr.msk.f32.mxu1 %vm2895_vm0, %v2894_v0 }
 0x585   :  { %2559 = vmatprep.subr.mxu1 %v2894_v0 }
 0x586   :  { %2560 = vmatpush3.msra.mxu1 %v3046_v32 }
 0x587   :  { %2561 = vmatprep.subr.mxu1 %v2894_v0 }
 0x588   :  { %2562 = vmatpush3.msra.mxu1 %v3056_v34  ;;  %v639_v27 = vpop.permute.xlu1 %638 }
 0x589   :  { %2563 = vmatprep.subr.mxu1 %v2894_v0 }
 0x58a   :  { %2564 = vmatpush3.msra.mxu1 %v3070_v37 }
 0x58b   :  { %2566 = vmatmul.mubr.msk.f32.vlgmr.msra.gmra.mxu1 %vm210_vm3, %v639_v27  ;;  %2579 = vmatprep.subr.mxu1 %v2894_v0 }
 0x58c   :  { %2580 = vmatpush3.msra.mxu1 %v2973_v8  ;;  %2587 = vmatprep.mubr.msk.f32.mxu1 %vm2895_vm0, %v2894_v0 }
 0x58d   :  { %2581 = vmatprep.subr.mxu1 %v2894_v0 }
 0x58e   :  { %2582 = vmatpush3.msra.mxu1 %v2982_v9 }
 0x58f   :  { %2583 = vmatprep.subr.mxu1 %v2894_v0 }
 0x590   :  { %2584 = vmatpush3.msra.mxu1 %v2991_v10 }
 0x591   :  { %2585 = vmatprep.subr.mxu1 %v2894_v0 }
 0x592   :  { %2586 = vmatpush3.msra.mxu1 %v2998_v11 }
 0x593   :  { %2588 = vmatmul.mubr.msk.f32.vlgmr.msra.gmra.mxu1 %vm210_vm3, %v639_v27  ;;  %2601 = vmatprep.subr.mxu1 %v2894_v0 }
 0x594   :  { %2602 = vmatpush3.msra.mxu1 %v2945_v1  ;;  %2609 = vmatprep.mubr.msk.f32.mxu1 %vm2895_vm0, %v2894_v0 }
 0x595   :  { %2603 = vmatprep.subr.mxu1 %v2894_v0 }
 0x596   :  { %2604 = vmatpush3.msra.mxu1 %v2947_v2 }
 0x597   :  { %2605 = vmatprep.subr.mxu1 %v2894_v0 }
 0x598   :  { %2606 = vmatpush3.msra.mxu1 %v2957_v5 }
 0x599   :  { %2607 = vmatprep.subr.mxu1 %v2894_v0 }
 0x59a   :  { %2608 = vmatpush3.msra.mxu1 %v2964_v7 }
 0x59b   :  { %2623 = vmatprep.subr.mxu1 %v2894_v0 }
 0x643   :  { %v542_v28 = vpop.f32.mrf.mxu1 }
 0x645   :  { %v2545_v30 = vpop.f32.mrf.mxu1 }
 0x64b   :  { %v708_v31 = vpop.f32.mrf.mxu1 }
 0x64c   :  { %v709_v33 = vadd.f32 %v708_v31, %v542_v28 }
 0x64d   :  { %v2567_v35 = vpop.f32.mrf.mxu1 }
 0x64e   :  { %v712_v36 = vadd.f32 %v3123_v49, %v709_v33 }
 0x650   :  { %2786 = vtanh.f32 %v712_v36 }
 0x653   :  { %v874_v39 = vpop.f32.mrf.mxu1 }
 0x654   :  { %v878_v40 = vadd.f32 %v874_v39, %v163_v38 }
 0x655   :  { %v2589_v41 = vpop.f32.mrf.mxu1 }
 0x656   :  { %2788 = vtanh.f32 %v878_v40 }
 0x65d   :  { %v2787_v42 = vpop.eup %2786 }
 0x65e   :  { %718 = vrot.lane.b32.xlu0 %v2787_v42, %s2896_s22  ;;  %v714_v51 = vmul.f32 0.5, %v2787_v42 }
 0x660   :  { %v715_v52 = vadd.f32 0.5, %v714_v51 }
 0x662   :  { %v716_v58 = vmul.f32 %v715_v52, %v3133_v16 }
 0x663   :  { %v2789_v50 = vpop.eup %2788 }
 0x664   :  { %884 = vrot.lane.b32.xlu1 %v2789_v50, %s2896_s22  ;;  %v880_v55 = vmul.f32 0.5, %v2789_v50 }
 0x666   :  { %v881_v56 = vadd.f32 0.5, %v880_v55 }
 0x668   :  { %v882_v61 = vmul.f32 %v881_v56, %v3137_v19 }
 0x6d0   :  { %v719_v53 = vpop.permute.xlu0 %718 }
 0x6d1   :  { %v721_v54 = vmul.f32 %v719_v53, %v715_v52 }
 0x6d3   :  { %723 = vrot.lane.b32.xlu0 %v721_v54, %s2897_s23 }
 0x6d6   :  { %v885_v57 = vpop.permute.xlu1 %884 }
 0x6d7   :  { %v887_v44 = vmul.f32 %v885_v57, %v881_v56 }
 0x6d9   :  { %889 = vrot.lane.b32.xlu1 %v887_v44, %s2897_s23 }
 0x745   :  { %v724_v59 = vpop.permute.xlu0 %723 }
 0x746   :  { %v3185_v60 = vadd.f32 %v724_v59, %v716_v58 }
 0x748   :  { %2790 = vtanh.f32 %v3185_v60 }
 0x74b   :  { %v890_v62 = vpop.permute.xlu1 %889 }
 0x74c   :  { %v3189_v63 = vadd.f32 %v890_v62, %v882_v61 }
 0x74e   :  { %2792 = vtanh.f32 %v3189_v63 }
 0x755   :  { %v2791_v3 = vpop.eup %2790 }
 0x756   :  { %729 = vrot.lane.b32.xlu0 %v2791_v3, %s2896_s22 }
 0x75b   :  { %v2793_v4 = vpop.eup %2792 }
 0x75c   :  { %895 = vrot.lane.b32.xlu1 %v2793_v4, %s2896_s22 }
 0x7c8   :  { %v730_v6 = vpop.permute.xlu0 %729 }
 0x7c9   :  { %v732_v12 = vmul.f32 %v730_v6, %v715_v52 }
 0x7cb   :  { %734 = vrot.lane.b32.xlu0 %v732_v12, %s2897_s23  ;;  %v173_v12 = vadd.f32 %v3022_v15, %v3114_v46 }
 0x7ce   :  { %v896_v13 = vpop.permute.xlu1 %895 }
 0x7cf   :  { %v898_v14 = vmul.f32 %v896_v13, %v881_v56 }
 0x7d1   :  { %900 = vrot.lane.b32.xlu1 %v898_v14, %s2897_s23 }
 0x83d   :  { %v735_v16 = vpop.permute.xlu0 %734 }
 0x83e   :  { %2577 = vmatmul.mubr.msk.f32.vlgmr.msra.gmra.mxu0 %vm210_vm3, %v735_v16 }
 0x83f   :  { %2591 = vmatpush3.msra.mxu0 %v3033_v29  ;;  %2598 = vmatprep.mubr.msk.f32.mxu0 %vm2895_vm0, %v2894_v0 }
 0x840   :  { %2592 = vmatprep.subr.mxu0 %v2894_v0 }
 0x841   :  { %2593 = vmatpush3.msra.mxu0 %v3046_v32 }
 0x842   :  { %2594 = vmatprep.subr.mxu0 %v2894_v0 }
 0x843   :  { %2595 = vmatpush3.msra.mxu0 %v3056_v34  ;;  %v901_v17 = vpop.permute.xlu1 %900 }
 0x844   :  { %2596 = vmatprep.subr.mxu0 %v2894_v0 }
 0x845   :  { %2597 = vmatpush3.msra.mxu0 %v3070_v37 }
 0x846   :  { %2599 = vmatmul.mubr.msk.f32.vlgmr.msra.gmra.mxu0 %vm210_vm3, %v901_v17  ;;  %2612 = vmatprep.subr.mxu0 %v2894_v0 }
 0x847   :  { %2613 = vmatpush3.msra.mxu0 %v2973_v8  ;;  %2620 = vmatprep.mubr.msk.f32.mxu0 %vm2895_vm0, %v2894_v0 }
 0x848   :  { %2614 = vmatprep.subr.mxu0 %v2894_v0 }
 0x849   :  { %2615 = vmatpush3.msra.mxu0 %v2982_v9 }
 0x84a   :  { %2616 = vmatprep.subr.mxu0 %v2894_v0 }
 0x84b   :  { %2617 = vmatpush3.msra.mxu0 %v2991_v10 }
 0x84c   :  { %2618 = vmatprep.subr.mxu0 %v2894_v0 }
 0x84d   :  { %2619 = vmatpush3.msra.mxu0 %v2998_v11 }
 0x84e   :  { %2621 = vmatmul.mubr.msk.f32.vlgmr.msra.gmra.mxu0 %vm210_vm3, %v901_v17  ;;  %2634 = vmatprep.subr.mxu0 %v2894_v0 }
 0x84f   :  { %2635 = vmatpush3.msra.mxu0 %v2945_v1  ;;  %2642 = vmatprep.mubr.msk.f32.mxu0 %vm2895_vm0, %v2894_v0 }
 0x850   :  { %2636 = vmatprep.subr.mxu0 %v2894_v0 }
 0x851   :  { %2637 = vmatpush3.msra.mxu0 %v2947_v2 }
 0x852   :  { %2638 = vmatprep.subr.mxu0 %v2894_v0 }
 0x853   :  { %2639 = vmatpush3.msra.mxu0 %v2957_v5 }
 0x854   :  { %2640 = vmatprep.subr.mxu0 %v2894_v0 }
 0x855   :  { %2641 = vmatpush3.msra.mxu0 %v2964_v7 }
 0x856   :  { %2656 = vmatprep.subr.mxu0 %v2894_v0 }
 0x8fe   :  { %v804_v18 = vpop.f32.mrf.mxu0 }
 0x900   :  { %v2578_v19 = vpop.f32.mrf.mxu0 }
 0x906   :  { %v970_v20 = vpop.f32.mrf.mxu0 }
 0x907   :  { %v971_v21 = vadd.f32 %v970_v20, %v804_v18 }
 0x908   :  { %v2600_v22 = vpop.f32.mrf.mxu0 }
 0x909   :  { %v974_v23 = vadd.f32 %v3123_v49, %v971_v21 }
 0x90b   :  { %2794 = vtanh.f32 %v974_v23 }
 0x90e   :  { %v1136_v25 = vpop.f32.mrf.mxu0 }
 0x90f   :  { %v1140_v26 = vadd.f32 %v1136_v25, %v168_v24 }
 0x910   :  { %v2622_v27 = vpop.f32.mrf.mxu0 }
 0x911   :  { %2796 = vtanh.f32 %v1140_v26 }
 0x918   :  { %v2795_v28 = vpop.eup %2794 }
 0x919   :  { %980 = vrot.lane.b32.xlu0 %v2795_v28, %s2896_s22  ;;  %v976_v31 = vmul.f32 0.5, %v2795_v28 }
 0x91b   :  { %v977_v33 = vadd.f32 0.5, %v976_v31 }
 0x91d   :  { %v978_v41 = vmul.f32 %v977_v33, %v3185_v60 }
 0x91e   :  { %v2797_v30 = vpop.eup %2796 }
 0x91f   :  { %1146 = vrot.lane.b32.xlu1 %v2797_v30, %s2896_s22  ;;  %v1142_v38 = vmul.f32 0.5, %v2797_v30 }
 0x921   :  { %v1143_v39 = vadd.f32 0.5, %v1142_v38 }
 0x923   :  { %v1144_v51 = vmul.f32 %v1143_v39, %v3189_v63 }
 0x98b   :  { %v981_v35 = vpop.permute.xlu0 %980 }
 0x98c   :  { %v983_v36 = vmul.f32 %v981_v35, %v977_v33 }
 0x98e   :  { %985 = vrot.lane.b32.xlu0 %v983_v36, %s2897_s23 }
 0x991   :  { %v1147_v40 = vpop.permute.xlu1 %1146 }
 0x992   :  { %v1149_v43 = vmul.f32 %v1147_v40, %v1143_v39 }
 0x994   :  { %1151 = vrot.lane.b32.xlu1 %v1149_v43, %s2897_s23 }
 0xa00   :  { %v986_v42 = vpop.permute.xlu0 %985 }
 0xa01   :  { %v3237_v50 = vadd.f32 %v986_v42, %v978_v41 }
 0xa03   :  { %2798 = vtanh.f32 %v3237_v50 }
 0xa06   :  { %v1152_v52 = vpop.permute.xlu1 %1151 }
 0xa07   :  { %v3241_v53 = vadd.f32 %v1152_v52, %v1144_v51 }
 0xa09   :  { %2800 = vtanh.f32 %v3241_v53 }
 0xa10   :  { %v2799_v54 = vpop.eup %2798 }
 0xa11   :  { %991 = vrot.lane.b32.xlu0 %v2799_v54, %s2896_s22 }
 0xa16   :  { %v2801_v55 = vpop.eup %2800 }
 0xa17   :  { %1157 = vrot.lane.b32.xlu1 %v2801_v55, %s2896_s22 }
 0xa83   :  { %v992_v56 = vpop.permute.xlu0 %991 }
 0xa84   :  { %v994_v57 = vmul.f32 %v992_v56, %v977_v33  ;;  %v178_v56 = vadd.f32 %v3112_v45, %v3022_v15 }
 0xa86   :  { %996 = vrot.lane.b32.xlu0 %v994_v57, %s2897_s23 }
 0xa89   :  { %v1158_v44 = vpop.permute.xlu1 %1157 }
 0xa8a   :  { %v1160_v58 = vmul.f32 %v1158_v44, %v1143_v39 }
 0xa8c   :  { %1162 = vrot.lane.b32.xlu1 %v1160_v58, %s2897_s23 }
 0xaf8   :  { %v997_v59 = vpop.permute.xlu0 %996 }
 0xaf9   :  { %2610 = vmatmul.mubr.msk.f32.vlgmr.msra.gmra.mxu1 %vm210_vm3, %v997_v59 }
 0xafa   :  { %2624 = vmatpush3.msra.mxu1 %v3033_v29  ;;  %2631 = vmatprep.mubr.msk.f32.mxu1 %vm2895_vm0, %v2894_v0 }
 0xafb   :  { %2625 = vmatprep.subr.mxu1 %v2894_v0 }
 0xafc   :  { %2626 = vmatpush3.msra.mxu1 %v3046_v32 }
 0xafd   :  { %2627 = vmatprep.subr.mxu1 %v2894_v0 }
 0xafe   :  { %2628 = vmatpush3.msra.mxu1 %v3056_v34  ;;  %v1163_v60 = vpop.permute.xlu1 %1162 }
 0xaff   :  { %2629 = vmatprep.subr.mxu1 %v2894_v0 }
 0xb00   :  { %2630 = vmatpush3.msra.mxu1 %v3070_v37 }
 0xb01   :  { %2632 = vmatmul.mubr.msk.f32.vlgmr.msra.gmra.mxu1 %vm210_vm3, %v1163_v60  ;;  %2645 = vmatprep.subr.mxu1 %v2894_v0 }
 0xb02   :  { %2646 = vmatpush3.msra.mxu1 %v2973_v8  ;;  %2653 = vmatprep.mubr.msk.f32.mxu1 %vm2895_vm0, %v2894_v0 }
 0xb03   :  { %2647 = vmatprep.subr.mxu1 %v2894_v0 }
 0xb04   :  { %2648 = vmatpush3.msra.mxu1 %v2982_v9 }
 0xb05   :  { %2649 = vmatprep.subr.mxu1 %v2894_v0 }
 0xb06   :  { %2650 = vmatpush3.msra.mxu1 %v2991_v10 }
 0xb07   :  { %2651 = vmatprep.subr.mxu1 %v2894_v0 }
 0xb08   :  { %2652 = vmatpush3.msra.mxu1 %v2998_v11 }
 0xb09   :  { %2654 = vmatmul.mubr.msk.f32.vlgmr.msra.gmra.mxu1 %vm210_vm3, %v1163_v60  ;;  %2667 = vmatprep.subr.mxu1 %v2894_v0 }
 0xb0a   :  { %2668 = vmatpush3.msra.mxu1 %v2945_v1  ;;  %2675 = vmatprep.mubr.msk.f32.mxu1 %vm2895_vm0, %v2894_v0 }
 0xb0b   :  { %2669 = vmatprep.subr.mxu1 %v2894_v0 }
 0xb0c   :  { %2670 = vmatpush3.msra.mxu1 %v2947_v2 }
 0xb0d   :  { %2671 = vmatprep.subr.mxu1 %v2894_v0 }
 0xb0e   :  { %2672 = vmatpush3.msra.mxu1 %v2957_v5 }
 0xb0f   :  { %2673 = vmatprep.subr.mxu1 %v2894_v0 }
 0xb10   :  { %2674 = vmatpush3.msra.mxu1 %v2964_v7 }
 0xb11   :  { %2689 = vmatprep.subr.mxu1 %v2894_v0 }
 0xbb9   :  { %v1066_v61 = vpop.f32.mrf.mxu1 }
 0xbbb   :  { %v2611_v62 = vpop.f32.mrf.mxu1 }
 0xbc1   :  { %v1232_v63 = vpop.f32.mrf.mxu1 }
 0xbc2   :  { %v1233_v3 = vadd.f32 %v1232_v63, %v1066_v61 }
 0xbc3   :  { %v2633_v4 = vpop.f32.mrf.mxu1 }
 0xbc4   :  { %v1236_v6 = vadd.f32 %v3123_v49, %v1233_v3 }
 0xbc6   :  { %2802 = vtanh.f32 %v1236_v6 }
 0xbc9   :  { %v1398_v13 = vpop.f32.mrf.mxu1 }
 0xbca   :  { %v1402_v14 = vadd.f32 %v1398_v13, %v173_v12 }
 0xbcb   :  { %v2655_v16 = vpop.f32.mrf.mxu1 }
 0xbcc   :  { %2804 = vtanh.f32 %v1402_v14 }
 0xbd3   :  { %v2803_v17 = vpop.eup %2802 }
 0xbd4   :  { %1242 = vrot.lane.b32.xlu0 %v2803_v17, %s2896_s22  ;;  %v1238_v19 = vmul.f32 0.5, %v2803_v17 }
 0xbd6   :  { %v1239_v20 = vadd.f32 0.5, %v1238_v19 }
 0xbd8   :  { %v1240_v26 = vmul.f32 %v1239_v20, %v3237_v50 }
 0xbd9   :  { %v2805_v18 = vpop.eup %2804 }
 0xbda   :  { %1408 = vrot.lane.b32.xlu1 %v2805_v18, %s2896_s22  ;;  %v1404_v23 = vmul.f32 0.5, %v2805_v18 }
 0xbdc   :  { %v1405_v24 = vadd.f32 0.5, %v1404_v23 }
 0xbde   :  { %v1406_v30 = vmul.f32 %v1405_v24, %v3241_v53 }
 0xc46   :  { %v1243_v21 = vpop.permute.xlu0 %1242 }
 0xc47   :  { %v1245_v22 = vmul.f32 %v1243_v21, %v1239_v20 }
 0xc49   :  { %1247 = vrot.lane.b32.xlu0 %v1245_v22, %s2897_s23 }
 0xc4c   :  { %v1409_v25 = vpop.permute.xlu1 %1408 }
 0xc4d   :  { %v1411_v46 = vmul.f32 %v1409_v25, %v1405_v24 }
 0xc4f   :  { %1413 = vrot.lane.b32.xlu1 %v1411_v46, %s2897_s23 }
 0xcbb   :  { %v1248_v27 = vpop.permute.xlu0 %1247 }
 0xcbc   :  { %v3289_v28 = vadd.f32 %v1248_v27, %v1240_v26 }
 0xcbe   :  { %2806 = vtanh.f32 %v3289_v28 }
 0xcc1   :  { %v1414_v31 = vpop.permute.xlu1 %1413 }
 0xcc2   :  { %v3293_v33 = vadd.f32 %v1414_v31, %v1406_v30 }
 0xcc4   :  { %2808 = vtanh.f32 %v3293_v33 }
 0xccb   :  { %v2807_v35 = vpop.eup %2806 }
 0xccc   :  { %1253 = vrot.lane.b32.xlu0 %v2807_v35, %s2896_s22 }
 0xcd1   :  { %v2809_v36 = vpop.eup %2808 }
 0xcd2   :  { %1419 = vrot.lane.b32.xlu1 %v2809_v36, %s2896_s22 }
 0xd3e   :  { %v1254_v38 = vpop.permute.xlu0 %1253 }
 0xd3f   :  { %v1256_v39 = vmul.f32 %v1254_v38, %v1239_v20 }
 0xd41   :  { %1258 = vrot.lane.b32.xlu0 %v1256_v39, %s2897_s23 }
 0xd44   :  { %v1420_v40 = vpop.permute.xlu1 %1419 }
 0xd45   :  { %v1422_v43 = vmul.f32 %v1420_v40, %v1405_v24 }
 0xd47   :  { %1424 = vrot.lane.b32.xlu1 %v1422_v43, %s2897_s23 }
 0xdb3   :  { %v1259_v41 = vpop.permute.xlu0 %1258 }
 0xdb4   :  { %2643 = vmatmul.mubr.msk.f32.vlgmr.msra.gmra.mxu0 %vm210_vm3, %v1259_v41 }
 0xdb5   :  { %2657 = vmatpush3.msra.mxu0 %v3033_v29  ;;  %2664 = vmatprep.mubr.msk.f32.mxu0 %vm2895_vm0, %v2894_v0 }
 0xdb6   :  { %2658 = vmatprep.subr.mxu0 %v2894_v0 }
 0xdb7   :  { %2659 = vmatpush3.msra.mxu0 %v3046_v32 }
 0xdb8   :  { %2660 = vmatprep.subr.mxu0 %v2894_v0 }
 0xdb9   :  { %2661 = vmatpush3.msra.mxu0 %v3056_v34  ;;  %v1425_v42 = vpop.permute.xlu1 %1424 }
 0xdba   :  { %2662 = vmatprep.subr.mxu0 %v2894_v0 }
 0xdbb   :  { %2663 = vmatpush3.msra.mxu0 %v3070_v37 }
 0xdbc   :  { %2665 = vmatmul.mubr.msk.f32.vlgmr.msra.gmra.mxu0 %vm210_vm3, %v1425_v42  ;;  %2678 = vmatprep.subr.mxu0 %v2894_v0 }
 0xdbd   :  { %2679 = vmatpush3.msra.mxu0 %v2973_v8  ;;  %2686 = vmatprep.mubr.msk.f32.mxu0 %vm2895_vm0, %v2894_v0 }
 0xdbe   :  { %2680 = vmatprep.subr.mxu0 %v2894_v0 }
 0xdbf   :  { %2681 = vmatpush3.msra.mxu0 %v2982_v9 }
 0xdc0   :  { %2682 = vmatprep.subr.mxu0 %v2894_v0 }
 0xdc1   :  { %2683 = vmatpush3.msra.mxu0 %v2991_v10 }
 0xdc2   :  { %2684 = vmatprep.subr.mxu0 %v2894_v0 }
 0xdc3   :  { %2685 = vmatpush3.msra.mxu0 %v2998_v11 }
 0xdc4   :  { %2687 = vmatmul.mubr.msk.f32.vlgmr.msra.gmra.mxu0 %vm210_vm3, %v1425_v42  ;;  %2700 = vmatprep.subr.mxu0 %v2894_v0 }
 0xdc5   :  { %2701 = vmatpush3.msra.mxu0 %v2945_v1  ;;  %2708 = vmatprep.mubr.msk.f32.mxu0 %vm2895_vm0, %v2894_v0 }
 0xdc6   :  { %2702 = vmatprep.subr.mxu0 %v2894_v0 }
 0xdc7   :  { %2703 = vmatpush3.msra.mxu0 %v2947_v2 }
 0xdc8   :  { %2704 = vmatprep.subr.mxu0 %v2894_v0 }
 0xdc9   :  { %2705 = vmatpush3.msra.mxu0 %v2957_v5 }
 0xdca   :  { %2706 = vmatprep.subr.mxu0 %v2894_v0 }
 0xdcb   :  { %2707 = vmatpush3.msra.mxu0 %v2964_v7 }
 0xdcc   :  { %2722 = vmatprep.subr.mxu0 %v2894_v0 }
 0xe74   :  { %v1328_v50 = vpop.f32.mrf.mxu0 }
 0xe76   :  { %v2644_v51 = vpop.f32.mrf.mxu0 }
 0xe7c   :  { %v1494_v52 = vpop.f32.mrf.mxu0 }
 0xe7d   :  { %v1495_v53 = vadd.f32 %v1494_v52, %v1328_v50 }
 0xe7e   :  { %v2666_v54 = vpop.f32.mrf.mxu0 }
 0xe7f   :  { %v1498_v55 = vadd.f32 %v3123_v49, %v1495_v53 }
 0xe81   :  { %2810 = vtanh.f32 %v1498_v55 }
 0xe84   :  { %v1660_v57 = vpop.f32.mrf.mxu0 }
 0xe85   :  { %v1664_v44 = vadd.f32 %v1660_v57, %v178_v56 }
 0xe86   :  { %v2688_v58 = vpop.f32.mrf.mxu0 }
 0xe87   :  { %2812 = vtanh.f32 %v1664_v44 }
 0xe8e   :  { %v2811_v59 = vpop.eup %2810 }
 0xe8f   :  { %1504 = vrot.lane.b32.xlu0 %v2811_v59, %s2896_s22  ;;  %v1500_v61 = vmul.f32 0.5, %v2811_v59 }
 0xe91   :  { %v1501_v62 = vadd.f32 0.5, %v1500_v61 }
 0xe93   :  { %v1502_v13 = vmul.f32 %v1501_v62, %v3289_v28 }
 0xe94   :  { %v2813_v60 = vpop.eup %2812 }
 0xe95   :  { %1670 = vrot.lane.b32.xlu1 %v2813_v60, %s2896_s22  ;;  %v1666_v4 = vmul.f32 0.5, %v2813_v60 }
 0xe97   :  { %v1667_v6 = vadd.f32 0.5, %v1666_v4 }
 0xe99   :  { %v1668_v17 = vmul.f32 %v1667_v6, %v3293_v33 }
 0xf01   :  { %v1505_v63 = vpop.permute.xlu0 %1504 }
 0xf02   :  { %v1507_v3 = vmul.f32 %v1505_v63, %v1501_v62 }
 0xf04   :  { %1509 = vrot.lane.b32.xlu0 %v1507_v3, %s2897_s23 }
 0xf07   :  { %v1671_v12 = vpop.permute.xlu1 %1670 }
 0xf08   :  { %v1673_v45 = vmul.f32 %v1671_v12, %v1667_v6 }
 0xf0a   :  { %1675 = vrot.lane.b32.xlu1 %v1673_v45, %s2897_s23 }
 0xf76   :  { %v1510_v14 = vpop.permute.xlu0 %1509 }
 0xf77   :  { %v3341_v16 = vadd.f32 %v1510_v14, %v1502_v13 }
 0xf79   :  { %2814 = vtanh.f32 %v3341_v16 }
 0xf7c   :  { %v1676_v18 = vpop.permute.xlu1 %1675 }
 0xf7d   :  { %v3345_v19 = vadd.f32 %v1676_v18, %v1668_v17 }
 0xf7f   :  { %2816 = vtanh.f32 %v3345_v19 }
 0xf86   :  { %v2815_v20 = vpop.eup %2814 }
 0xf87   :  { %1515 = vrot.lane.b32.xlu0 %v2815_v20, %s2896_s22 }
 0xf8c   :  { %v2817_v21 = vpop.eup %2816 }
 0xf8d   :  { %1681 = vrot.lane.b32.xlu1 %v2817_v21, %s2896_s22 }
 0xff9   :  { %v1516_v22 = vpop.permute.xlu0 %1515 }
 0xffa   :  { %v1518_v23 = vmul.f32 %v1516_v22, %v1501_v62 }
 0xffc   :  { %1520 = vrot.lane.b32.xlu0 %v1518_v23, %s2897_s23 }
 0xfff   :  { %v1682_v24 = vpop.permute.xlu1 %1681 }
0x1000   :  { %v1684_v25 = vmul.f32 %v1682_v24, %v1667_v6  ;;  %v2842_v6 = vld [vmem:[%s3479_s3] ss:$0 sm:$0xff] }
0x1001   :  { %v188_v12 = vadd.f32 %v2842_v6, %v3116_v47 }
0x1002   :  { %1686 = vrot.lane.b32.xlu1 %v1684_v25, %s2897_s23 }
0x106e   :  { %v1521_v46 = vpop.permute.xlu0 %1520 }
0x106f   :  { %2676 = vmatmul.mubr.msk.f32.vlgmr.msra.gmra.mxu1 %vm210_vm3, %v1521_v46 }
0x1070   :  { %2690 = vmatpush3.msra.mxu1 %v3033_v29  ;;  %2697 = vmatprep.mubr.msk.f32.mxu1 %vm2895_vm0, %v2894_v0 }
0x1071   :  { %2691 = vmatprep.subr.mxu1 %v2894_v0 }
0x1072   :  { %2692 = vmatpush3.msra.mxu1 %v3046_v32 }
0x1073   :  { %2693 = vmatprep.subr.mxu1 %v2894_v0 }
0x1074   :  { %2694 = vmatpush3.msra.mxu1 %v3056_v34  ;;  %v1687_v26 = vpop.permute.xlu1 %1686 }
0x1075   :  { %2695 = vmatprep.subr.mxu1 %v2894_v0 }
0x1076   :  { %2696 = vmatpush3.msra.mxu1 %v3070_v37 }
0x1077   :  { %2698 = vmatmul.mubr.msk.f32.vlgmr.msra.gmra.mxu1 %vm210_vm3, %v1687_v26  ;;  %2711 = vmatprep.subr.mxu1 %v2894_v0 }
0x1078   :  { %2712 = vmatpush3.msra.mxu1 %v2973_v8  ;;  %2719 = vmatprep.mubr.msk.f32.mxu1 %vm2895_vm0, %v2894_v0 }
0x1079   :  { %2713 = vmatprep.subr.mxu1 %v2894_v0 }
0x107a   :  { %2714 = vmatpush3.msra.mxu1 %v2982_v9 }
0x107b   :  { %2715 = vmatprep.subr.mxu1 %v2894_v0 }
0x107c   :  { %2716 = vmatpush3.msra.mxu1 %v2991_v10 }
0x107d   :  { %2717 = vmatprep.subr.mxu1 %v2894_v0 }
0x107e   :  { %2718 = vmatpush3.msra.mxu1 %v2998_v11 }
0x107f   :  { %2720 = vmatmul.mubr.msk.f32.vlgmr.msra.gmra.mxu1 %vm210_vm3, %v1687_v26  ;;  %2733 = vmatprep.subr.mxu1 %v2894_v0 }
0x1080   :  { %2734 = vmatpush3.msra.mxu1 %v2945_v1  ;;  %2741 = vmatprep.mubr.msk.f32.mxu1 %vm2895_vm0, %v2894_v0 }
0x1081   :  { %2735 = vmatprep.subr.mxu1 %v2894_v0 }
0x1082   :  { %2736 = vmatpush3.msra.mxu1 %v2947_v2  ;;  %v183_v2 = vadd.f32 %v3022_v15, %v3118_v48 }
0x1083   :  { %2737 = vmatprep.subr.mxu1 %v2894_v0 }
0x1084   :  { %2738 = vmatpush3.msra.mxu1 %v2957_v5 }
0x1085   :  { %2739 = vmatprep.subr.mxu1 %v2894_v0 }
0x1086   :  { %2740 = vmatpush3.msra.mxu1 %v2964_v7 }
0x1087   :  { %2755 = vmatprep.subr.mxu1 %v2894_v0 }
0x112f   :  { %v1590_v8 = vpop.f32.mrf.mxu1 }
0x1131   :  { %v2677_v9 = vpop.f32.mrf.mxu1 }
0x1137   :  { %v1756_v1 = vpop.f32.mrf.mxu1 }
0x1138   :  { %v1757_v10 = vadd.f32 %v1756_v1, %v1590_v8 }
0x1139   :  { %v2699_v11 = vpop.f32.mrf.mxu1 }
0x113a   :  { %v1760_v27 = vadd.f32 %v3123_v49, %v1757_v10 }
0x113c   :  { %2818 = vtanh.f32 %v1760_v27 }
0x113f   :  { %v1922_v28 = vpop.f32.mrf.mxu1 }
0x1140   :  { %v1926_v30 = vadd.f32 %v1922_v28, %v183_v2 }
0x1141   :  { %v2721_v5 = vpop.f32.mrf.mxu1 }
0x1142   :  { %2820 = vtanh.f32 %v1926_v30 }
0x1149   :  { %v2819_v31 = vpop.eup %2818 }
0x114a   :  { %1766 = vrot.lane.b32.xlu0 %v2819_v31, %s2896_s22  ;;  %v1762_v33 = vmul.f32 0.5, %v2819_v31  ;;  %v2843_v31 = vld [vmem:[%s3480_s4 + $0x18] sm:$0xff] }
0x114c   :  { %v1763_v35 = vadd.f32 0.5, %v1762_v33  ;;  %v2845_v33 = vld [vmem:[%s3480_s4 + $0x8] sm:$0xff] }
0x114e   :  { %v1764_v48 = vmul.f32 %v1763_v35, %v3341_v16 }
0x114f   :  { %v2821_v7 = vpop.eup %2820 }
0x1150   :  { %1932 = vrot.lane.b32.xlu1 %v2821_v7, %s2896_s22  ;;  %v1928_v39 = vmul.f32 0.5, %v2821_v7  ;;  %v2844_v7 = vld [vmem:[%s3480_s4 + $0x10] sm:$0xff] }
0x1152   :  { %v1929_v40 = vadd.f32 0.5, %v1928_v39 }
0x1154   :  { %v1930_v50 = vmul.f32 %v1929_v40, %v3345_v19 }
0x11bc   :  { %v1767_v36 = vpop.permute.xlu0 %1766 }
0x11bd   :  { %v1769_v38 = vmul.f32 %v1767_v36, %v1763_v35  ;;  %v2846_v36 = vld [vmem:[%s3480_s4] sm:$0xff]  ;;  %s2898_s4 = smov [#allocation5]  }
0x11be   :  { %s2317_s1 = sshll.u32 %s2898_s4, 4  ;;  %s2318_s1 = int_to_ptr.vmem [resolvable:$true] %s2317_s1 }
0x11bf   :  { %1771 = vrot.lane.b32.xlu0 %v1769_v38, %s2897_s23  ;;  %s2867_s13 = scalar_lea.vmem %s2318_s1, 32  ;;  %p2872_p6 = scmp.lt.s32.totalorder %s2318_s1, %s2318_s1 }
0x11c0   :  { %p2868_p5 = scmp.ne.s32.totalorder %s2318_s1, %s2867_s13  ;;  %p2873_p7 = scmp.lt.s32.totalorder %s2867_s13, %s2867_s13 }
0x11c2   :  { %v1933_v43 = vpop.permute.xlu1 %1932  ;;  %p2874_p8 = por %p2873_p7, %p2872_p6 }
0x11c3   :  { %v1935_v15 = vmul.f32 %v1933_v43, %v1929_v40 }
0x11c4   :  { %p2875_p9 = pnand %p2874_p8, %p2868_p5 }
0x11c5   :  { %1937 = vrot.lane.b32.xlu1 %v1935_v15, %s2897_s23 }
0x1231   :  { %v1772_v41 = vpop.permute.xlu0 %1771 }
0x1232   :  { %v3393_v42 = vadd.f32 %v1772_v41, %v1764_v48 }
0x1234   :  { %2822 = vtanh.f32 %v3393_v42 }
0x1237   :  { %v1938_v51 = vpop.permute.xlu1 %1937 }
0x1238   :  { %v3397_v52 = vadd.f32 %v1938_v51, %v1930_v50 }
0x123a   :  { %2824 = vtanh.f32 %v3397_v52 }
0x1241   :  { %v2823_v53 = vpop.eup %2822 }
0x1242   :  { %1777 = vrot.lane.b32.xlu0 %v2823_v53, %s2896_s22 }
0x1247   :  { %v2825_v54 = vpop.eup %2824 }
0x1248   :  { %1943 = vrot.lane.b32.xlu1 %v2825_v54, %s2896_s22 }
0x12b4   :  { %v1778_v55 = vpop.permute.xlu0 %1777 }
0x12b5   :  { %v1780_v56 = vmul.f32 %v1778_v55, %v1763_v35 }
0x12b7   :  { %1782 = vrot.lane.b32.xlu0 %v1780_v56, %s2897_s23 }
0x12ba   :  { %v1944_v57 = vpop.permute.xlu1 %1943 }
0x12bb   :  { %v1946_v44 = vmul.f32 %v1944_v57, %v1929_v40 }
0x12bd   :  { %1948 = vrot.lane.b32.xlu1 %v1946_v44, %s2897_s23 }
0x1329   :  { %v1783_v58 = vpop.permute.xlu0 %1782 }
0x132a   :  { %2709 = vmatmul.mubr.msk.f32.vlgmr.msra.gmra.mxu0 %vm210_vm3, %v1783_v58 }
0x132b   :  { %2723 = vmatpush3.msra.mxu0 %v3033_v29  ;;  %2730 = vmatprep.mubr.msk.f32.mxu0 %vm2895_vm0, %v2894_v0  ;;  %v2838_v29 = vld [vmem:[%s3478_s2 + $0x18] sm:$0xff] }
0x132c   :  { %2724 = vmatprep.subr.mxu0 %v2894_v0 }
0x132d   :  { %2725 = vmatpush3.msra.mxu0 %v3046_v32  ;;  %v2839_v32 = vld [vmem:[%s3478_s2 + $0x10] sm:$0xff] }
0x132e   :  { %2726 = vmatprep.subr.mxu0 %v2894_v0 }
0x132f   :  { %2727 = vmatpush3.msra.mxu0 %v3056_v34  ;;  %v1949_v59 = vpop.permute.xlu1 %1948  ;;  %v2840_v34 = vld [vmem:[%s3478_s2 + $0x8] sm:$0xff] }
0x1330   :  { %2728 = vmatprep.subr.mxu0 %v2894_v0 }
0x1331   :  { %2729 = vmatpush3.msra.mxu0 %v3070_v37  ;;  %v2841_v37 = vld [vmem:[%s3478_s2] sm:$0xff] }
0x1332   :  { %2731 = vmatmul.mubr.msk.f32.vlgmr.msra.gmra.mxu0 %vm210_vm3, %v1949_v59  ;;  %2744 = vmatprep.subr.mxu0 %v2894_v0 }
0x1333   :  { %2745 = vmatpush3.msra.mxu0 %v2838_v29  ;;  %2752 = vmatprep.mubr.msk.f32.mxu0 %vm2895_vm0, %v2894_v0 }
0x1334   :  { %2746 = vmatprep.subr.mxu0 %v2894_v0 }
0x1335   :  { %2747 = vmatpush3.msra.mxu0 %v2839_v32 }
0x1336   :  { %2748 = vmatprep.subr.mxu0 %v2894_v0 }
0x1337   :  { %2749 = vmatpush3.msra.mxu0 %v2840_v34 }
0x1338   :  { %2750 = vmatprep.subr.mxu0 %v2894_v0 }
0x1339   :  { %2751 = vmatpush3.msra.mxu0 %v2841_v37 }
0x133a   :  { %2753 = vmatmul.mubr.msk.f32.vlgmr.msra.gmra.mxu0 %vm210_vm3, %v1949_v59 }
0x13ea   :  { %v1852_v60 = vpop.f32.mrf.mxu0 }
0x13ec   :  { %v2710_v61 = vpop.f32.mrf.mxu0 }
0x13f2   :  { %v2018_v62 = vpop.f32.mrf.mxu0 }
0x13f3   :  { %v2019_v63 = vadd.f32 %v2018_v62, %v1852_v60 }
0x13f4   :  { %v2732_v3 = vpop.f32.mrf.mxu0 }
0x13f5   :  { %v2022_v4 = vadd.f32 %v3123_v49, %v2019_v63 }
0x13f7   :  { %2826 = vtanh.f32 %v2022_v4 }
0x13fa   :  { %v2184_v45 = vpop.f32.mrf.mxu0 }
0x13fb   :  { %v2188_v13 = vadd.f32 %v2184_v45, %v188_v12 }
0x13fc   :  { %v2754_v14 = vpop.f32.mrf.mxu0 }
0x13fd   :  { %2828 = vtanh.f32 %v2188_v13 }
0x1404   :  { %v2827_v16 = vpop.eup %2826 }
0x1405   :  { %2028 = vrot.lane.b32.xlu0 %v2827_v16, %s2896_s22  ;;  %v2024_v18 = vmul.f32 0.5, %v2827_v16 }
0x1407   :  { %v2025_v19 = vadd.f32 0.5, %v2024_v18 }
0x1409   :  { %v2026_v25 = vmul.f32 %v2025_v19, %v3393_v42 }
0x140a   :  { %v2829_v17 = vpop.eup %2828 }
0x140b   :  { %2194 = vrot.lane.b32.xlu1 %v2829_v17, %s2896_s22  ;;  %v2190_v22 = vmul.f32 0.5, %v2829_v17 }
0x140d   :  { %v2191_v23 = vadd.f32 0.5, %v2190_v22 }
0x140f   :  { %v2192_v8 = vmul.f32 %v2191_v23, %v3397_v52 }
0x1477   :  { %v2029_v20 = vpop.permute.xlu0 %2028 }
0x1478   :  { %v2031_v21 = vmul.f32 %v2029_v20, %v2025_v19 }
0x147a   :  { %2033 = vrot.lane.b32.xlu0 %v2031_v21, %s2897_s23 }
0x147d   :  { %v2195_v24 = vpop.permute.xlu1 %2194 }
0x147e   :  { %v2197_v47 = vmul.f32 %v2195_v24, %v2191_v23 }
0x1480   :  { %2199 = vrot.lane.b32.xlu1 %v2197_v47, %s2897_s23 }
0x14ec   :  { %v2034_v46 = vpop.permute.xlu0 %2033 }
0x14ed   :  { %v2036_v26 = vadd.f32 %v2034_v46, %v2026_v25 }
0x14ef   :  { %2830 = vtanh.f32 %v2036_v26 }
0x14f2   :  { %v2200_v9 = vpop.permute.xlu1 %2199 }
0x14f3   :  { %v2202_v1 = vadd.f32 %v2200_v9, %v2192_v8 }
0x14f5   :  { %2832 = vtanh.f32 %v2202_v1 }
0x14fc   :  { %v2831_v10 = vpop.eup %2830 }
0x14fd   :  { %2039 = vrot.lane.b32.xlu0 %v2831_v10, %s2896_s22 }
0x1502   :  { %v2833_v11 = vpop.eup %2832 }
0x1503   :  { %2205 = vrot.lane.b32.xlu1 %v2833_v11, %s2896_s22 }
0x156f   :  { %v2040_v27 = vpop.permute.xlu0 %2039 }
0x1570   :  { %v2042_v2 = vmul.f32 %v2040_v27, %v2025_v19 }
0x1572   :  { %2044 = vrot.lane.b32.xlu0 %v2042_v2, %s2897_s23 }
0x1575   :  { %v2206_v28 = vpop.permute.xlu1 %2205 }
0x1576   :  { %v2208_v30 = vmul.f32 %v2206_v28, %v2191_v23 }
0x1578   :  { %2210 = vrot.lane.b32.xlu1 %v2208_v30, %s2897_s23 }
0x15e4   :  { %v2045_v5 = vpop.permute.xlu0 %2044 }
0x15e5   :  { %2742 = vmatmul.mubr.msk.f32.vlgmr.msra.gmra.mxu1 %vm210_vm3, %v2045_v5 }
0x15e6   :  { %2756 = vmatpush3.msra.mxu1 %v2843_v31  ;;  %2763 = vmatprep.mubr.msk.f32.mxu1 %vm2895_vm0, %v2894_v0 }
0x15e7   :  { %2757 = vmatprep.subr.mxu1 %v2894_v0 }
0x15e8   :  { %2758 = vmatpush3.msra.mxu1 %v2844_v7 }
0x15e9   :  { %2759 = vmatprep.subr.mxu1 %v2894_v0 }
0x15ea   :  { %2760 = vmatpush3.msra.mxu1 %v2845_v33  ;;  %v2211_v35 = vpop.permute.xlu1 %2210 }
0x15eb   :  { %2761 = vmatprep.subr.mxu1 %v2894_v0 }
0x15ec   :  { %2762 = vmatpush3.msra.mxu1 %v2846_v36 }
0x15ed   :  { %2764 = vmatmul.mubr.msk.f32.vlgmr.msra.gmra.mxu1 %vm210_vm3, %v2211_v35 }
0x16a5   :  { %v2114_v38 = vpop.f32.mrf.mxu1 }
0x16a7   :  { %v2743_v39 = vpop.f32.mrf.mxu1 }
0x16ad   :  { %v2280_v40 = vpop.f32.mrf.mxu1 }
0x16ae   :  { %v2281_v43 = vadd.f32 %v2280_v40, %v2114_v38 }
0x16af   :  { %v2765_v15 = vpop.f32.mrf.mxu1 }
0x16b0   :  { %v2284_v48 = vadd.f32 %v3123_v49, %v2281_v43 }
0x16b2   :  { %2834 = vtanh.f32 %v2284_v48 }
0x16bf   :  { %v2835_v41 = vpop.eup %2834 }
0x16c0   :  { %2290 = vrot.lane.b32.xlu0 %v2835_v41, %s2896_s22  ;;  %v2286_v42 = vmul.f32 0.5, %v2835_v41 }
0x16c2   :  { %v2287_v0 = vadd.f32 0.5, %v2286_v42 }
0x16c4   :  { %v2288_v52 = vmul.f32 %v2287_v0, %v2036_v26 }
0x1732   :  { %v2291_v50 = vpop.permute.xlu0 %2290 }
0x1733   :  { %v2293_v51 = vmul.f32 %v2291_v50, %v2287_v0 }
0x1735   :  { %2295 = vrot.lane.b32.xlu1 %v2293_v51, %s2897_s23 }
0x17a7   :  { %v2296_v53 = vpop.permute.xlu1 %2295 }
0x17a8   :  { %v2298_v54 = vadd.f32 %v2296_v53, %v2288_v52 }
0x17aa   :  { %2836 = vtanh.f32 %v2298_v54 }
0x17b7   :  { %v2837_v55 = vpop.eup %2836 }
0x17b8   :  { %2301 = vrot.lane.b32.xlu0 %v2837_v55, %s2896_s22 }
0x182a   :  { %v2302_v56 = vpop.permute.xlu0 %2301 }
0x182b   :  { %v2304_v57 = vmul.f32 %v2302_v56, %v2287_v0 }
0x182d   :  { %2306 = vrot.lane.b32.xlu1 %v2304_v57, %s2897_s23 }
0x189f   :  { %v2307_v49 = vpop.permute.xlu1 %2306 }
0x18a0   :  { %2310 = vst.msk [vmem:[#allocation5] sm:$0x3] %vm2309_vm4, %v2307_v49 }
0x18a1   :  { %2878 = shalt.err (!%p2875_p9)
}
0x18a2   :  { %2320 = dma.vmem_to_hbm [thread:$0]  %s2318_s1, 32, %s3483_s7, [#allocation4]  }
0x18a3   :  { %2889 = dma.done.wait [#allocation4], 32  }
0x18a4   :  { %2890 = vsyncadd [#allocation4], 4294967264 }
0x18a5   :  { %2324 = vsyncpa [#allocation3], 1 }
0x18a6   :  { %2325 = vsyncpa [#allocation4], 1 }

</bundles_post_ra>
